<compile_context>
chip_gen: v5e
topology: v5e:2x2
jax: 0.10.0
libtpu: 0.0.40
codegen_flags: <defaults>
</compile_context>

<pallas_src>
import math

import numpy as np

import jax
import jax.numpy as jnp
from jax.experimental import pallas as pl
from jax.experimental.pallas import tpu as pltpu

MIN_LANES = 8  # pad tiny spatial tails up to 8 lanes (constants only)


# ----------------------- static structure (numpy, host) -----------------------

def _reflect(j, n):
    """PyTorch ReflectionPad2d index mapping for pad=1 (no edge repeat)."""
    if j < 0:
        return -j
    if j >= n:
        return 2 * (n - 1) - j
    return j


def _conv_out(h):
    # 3x3 conv, stride 3, reflection pad 1: floor((h + 2 - 3) / 3) + 1
    return (h - 1) // 3 + 1


def _gather_mats(hi, wi, s_in_p, s_out_p):
    """G[k] (0/1) such that (act @ G[k])[:, ho*Wo+wo] == act[:, refl-padded
    (3ho+kh, 3wo+kw)] : reflection pad + 3x3 patch extraction + stride 3."""
    ho, wo = _conv_out(hi), _conv_out(wi)
    g = np.zeros((9, s_in_p, s_out_p), np.float32)
    for kh in range(3):
        for kw in range(3):
            k = kh * 3 + kw
            for oh in range(ho):
                for ow in range(wo):
                    sh = _reflect(3 * oh + kh - 1, hi)
                    sw = _reflect(3 * ow + kw - 1, wi)
                    g[k, sh * wi + sw, oh * wo + ow] = 1.0
    return g


# ------------------------------ Pallas kernel --------------------------------

def _channel_att_kernel(x_ref, w1_ref, wst_ref, g2_ref, g3_ref, g4_ref,
                        cb_ref, al_ref, pool_ref,
                        mw1_ref, mb1_ref, mw2_ref, mb2_ref, o_ref):
    # ---- conv1: 1x1 conv + PReLU (the stride-3 subsample happened on host) --
    x = x_ref[0]                                               # (4, S1)
    acc = jnp.dot(w1_ref[...], x, preferred_element_type=jnp.float32)
    acc = acc + cb_ref[0]                                      # bias (4, 1)
    act = jnp.where(acc > 0.0, acc, acc * al_ref[0])           # PReLU (shared a)

    # ---- conv2..conv4: reflect pad + 3x3 / stride-3 conv via 9 gathers ------
    for l, g_ref in enumerate((g2_ref, g3_ref, g4_ref)):
        s_out = g_ref.shape[2]
        acc = jnp.zeros((act.shape[0], s_out), jnp.float32)
        for k in range(9):                                     # static unroll
            patches = jnp.dot(act, g_ref[k],
                              preferred_element_type=jnp.float32)   # (4, S_out)
            acc = acc + jnp.dot(wst_ref[l, k], patches,
                                preferred_element_type=jnp.float32)
        acc = acc + cb_ref[l + 1]
        act = jnp.where(acc > 0.0, acc, acc * al_ref[l + 1])

    # ---- adaptive avg pool (constant pooling matrix) + MLP + sigmoid --------
    pooled = jnp.dot(act, pool_ref[...], preferred_element_type=jnp.float32)
    hid = jnp.dot(mw1_ref[...], pooled, preferred_element_type=jnp.float32)
    hid = jnp.maximum(hid + mb1_ref[...], 0.0)                 # Linear + ReLU
    y = jnp.dot(mw2_ref[...], hid, preferred_element_type=jnp.float32)
    y = y + mb2_ref[...]                                       # Linear
    o_ref[0] = jax.nn.sigmoid(y[:, 0:1])                       # (4, 1)


# -------------------------------- wrapper ------------------------------------

def channel_att_forward(params, x):
    """x: (B, 4, H, W) NCHW -> channel scale (B, 4, 1, 1), matches ChannelAtt."""
    B, C, H, W = x.shape
    assert C == 4

    # conv1 is k=1 / stride=3: byte-reducing subsample on host (no expansion),
    # channel mixing + PReLU in the kernel; spatial goes on the lane axis.
    x_sub = x[:, :, ::3, ::3]
    H1, W1 = x_sub.shape[2], x_sub.shape[3]
    x_sub = x_sub.reshape(B, C, H1 * W1)

    # static spatial chain for conv2..conv4
    hw = [(H1, W1)]
    for _ in range(3):
        hw.append((_conv_out(hw[-1][0]), _conv_out(hw[-1][1])))
    s_real = [h * w for h, w in hw]
    s_pad = [s_real[0]] + [max(s, MIN_LANES) for s in s_real[1:]]

    g_mats = [jnp.asarray(_gather_mats(hw[l][0], hw[l][1], s_pad[l], s_pad[l + 1]))
              for l in range(3)]

    # avg-pool matrix: column 0 averages the real spatial positions of conv4.
    pool = np.zeros((s_pad[3], MIN_LANES), np.float32)
    pool[:s_real[3], 0] = 1.0 / s_real[3]
    pool = jnp.asarray(pool)

    # conv weights / biases / PReLU slopes
    w1c = params["conv1"][0].reshape(4, 4)                        # 1x1 conv
    wstack = jnp.stack([jnp.transpose(params[f"conv{i}"][0], (2, 3, 0, 1))
                        .reshape(9, 4, 4) for i in (2, 3, 4)])    # (3, 9, 4, 4)
    cbias = jnp.stack([params[f"conv{i}"][1]
                       for i in (1, 2, 3, 4)]).reshape(4, 4, 1)
    alphas = jnp.stack([jnp.asarray(params[f"conv{i}"][2], jnp.float32)
                        for i in (1, 2, 3, 4)]).reshape(4, 1, 1)

    mw1, mb1, mw2, mb2 = params["mlp"]
    hid = mw1.shape[0]
    mb1 = mb1.reshape(hid, 1)
    mb2 = mb2.reshape(4, 1)

    def pinned(shape):
        return pl.BlockSpec(shape, lambda b: (0,) * len(shape))

    # advisory cost estimate for XLA's scheduler
    flops = 2 * 4 * 4 * s_real[0]
    for l in range(3):
        flops += 9 * (2 * 4 * s_pad[l] * s_pad[l + 1] + 2 * 4 * 4 * s_pad[l + 1])
    flops += 2 * 4 * s_pad[3] * MIN_LANES
    flops += 2 * hid * 4 * MIN_LANES + 2 * 4 * hid * MIN_LANES
    flops *= B
    bytes_accessed = 4 * (x_sub.size + w1c.size + wstack.size + cbias.size
                          + alphas.size + pool.size + mw1.size + mb1.size
                          + mw2.size + mb2.size
                          + sum(int(g.size) for g in g_mats) + B * 4)

    out = pl.pallas_call(
        _channel_att_kernel,
        out_shape=jax.ShapeDtypeStruct((B, 4, 1), jnp.float32),
        grid=(B,),
        in_specs=[
            pl.BlockSpec((1, 4, s_real[0]), lambda b: (b, 0, 0)),  # x_sub
            pinned((4, 4)),                                        # conv1 weight
            pinned((3, 9, 4, 4)),                                  # conv2-4 weights
            pinned((9, s_pad[0], s_pad[1])),                       # gather conv2
            pinned((9, s_pad[1], s_pad[2])),                       # gather conv3
            pinned((9, s_pad[2], s_pad[3])),                       # gather conv4
            pinned((4, 4, 1)),                                     # conv biases
            pinned((4, 1, 1)),                                     # PReLU alphas
            pinned((s_pad[3], MIN_LANES)),                         # pool matrix
            pinned((hid, 4)),                                      # mlp w1
            pinned((hid, 1)),                                      # mlp b1
            pinned((4, hid)),                                      # mlp w2
            pinned((4, 1)),                                        # mlp b2
        ],
        out_specs=pl.BlockSpec((1, 4, 1), lambda b: (b, 0, 0)),
        compiler_params=pltpu.CompilerParams(
            dimension_semantics=("parallel",),
            vmem_limit_bytes=32 * 1024 * 1024),
        cost_estimate=pl.CostEstimate(flops=int(flops),
                                      transcendentals=int(4 * B),
                                      bytes_accessed=int(bytes_accessed)),
    )(x_sub, w1c, wstack, g_mats[0], g_mats[1], g_mats[2], cbias, alphas,
      pool, mw1, mb1, mw2, mb2)
    return out.reshape(B, 4, 1, 1)


# ------------------------- pure-JAX reference (check) -------------------------

def _reference_forward(params, x):
    out = x
    for i, (k, s) in enumerate([(1, 3), (3, 3), (3, 3), (3, 3)]):
        w, b, alpha = params[f"conv{i + 1}"]
        pad = k // 2
        if pad:
            out = jnp.pad(out, ((0, 0), (0, 0), (pad, pad), (pad, pad)),
                          mode="reflect")
        out = jax.lax.conv_general_dilated(
            out, w, (s, s), "VALID",
            dimension_numbers=("NCHW", "OIHW", "NCHW"))
        out = out + b.reshape(1, -1, 1, 1)
        out = jnp.where(out > 0, out, alpha * out)             # PReLU
    pooled = out.mean(axis=(2, 3))                             # AdaptiveAvgPool2d(1)
    w1, b1, w2, b2 = params["mlp"]
    h = jnp.maximum(pooled @ w1.T + b1, 0.0)
    y = h @ w2.T + b2
    return jax.nn.sigmoid(y).reshape(x.shape[0], 4, 1, 1)


# ------------------------------ parameter init --------------------------------

def init_params(key, gate_channels=4, reduction_ratio=1):
    conv_ks = [1, 3, 3, 3]
    keys = jax.random.split(key, 2 * len(conv_ks) + 4)
    params = {}
    for i, k in enumerate(conv_ks):
        fan_in = 4 * k * k
        bound = 1.0 / math.sqrt(fan_in)
        w = jax.random.uniform(keys[2 * i], (4, 4, k, k), jnp.float32,
                               -bound, bound)
        b = jax.random.uniform(keys[2 * i + 1], (4,), jnp.float32,
                               -bound, bound)
        alpha = jnp.float32(0.25)                  # nn.PReLU default init
        params[f"conv{i + 1}"] = (w, b, alpha)

    hid = gate_channels // reduction_ratio
    kb = 2 * len(conv_ks)
    bound1 = 1.0 / math.sqrt(gate_channels)
    w1 = jax.random.uniform(keys[kb], (hid, gate_channels), jnp.float32,
                            -bound1, bound1)
    b1 = jax.random.uniform(keys[kb + 1], (hid,), jnp.float32, -bound1, bound1)
    bound2 = 1.0 / math.sqrt(hid)
    w2 = jax.random.uniform(keys[kb + 2], (gate_channels, hid), jnp.float32,
                            -bound2, bound2)
    b2 = jax.random.uniform(keys[kb + 3], (gate_channels,), jnp.float32,
                            -bound2, bound2)
    params["mlp"] = (w1, b1, w2, b2)
    return params


if __name__ == "__main__":
    key = jax.random.PRNGKey(0)
    k_x, k_p = jax.random.split(key)
    # H=W=28 is the smallest spatial size keeping every intermediate >= 2
    # before its ReflectionPad (PyTorch errors otherwise): 28 -> 10 -> 4 -> 2 -> 1.
    x = jax.random.normal(k_x, (2, 4, 28, 28), dtype=jnp.float32)
    params = init_params(k_p, gate_channels=4, reduction_ratio=1)

    scale = jax.block_until_ready(channel_att_forward(params, x))
    assert scale.shape == (2, 4, 1, 1), scale.shape
    assert bool(jnp.all((scale >= 0.0) & (scale <= 1.0)))      # sigmoid range

    ref = jax.block_until_ready(_reference_forward(params, x))
    np.testing.assert_allclose(np.asarray(scale), np.asarray(ref),
                               atol=5e-3, rtol=5e-3)
    print("KERNEL_OK")
</pallas_src>

<mosaic_0001>
module attributes {stable_mosaic.version = 11 : i64} {
  func.func @_channel_att_kernel(%arg0: i32, %arg1: memref<1x4x100xf32, #tpu.memory_space<vmem>>, %arg2: memref<4x4xf32, #tpu.memory_space<vmem>>, %arg3: memref<3x9x4x4xf32, #tpu.memory_space<vmem>>, %arg4: memref<9x100x16xf32, #tpu.memory_space<vmem>>, %arg5: memref<9x16x8xf32, #tpu.memory_space<vmem>>, %arg6: memref<9x8x8xf32, #tpu.memory_space<vmem>>, %arg7: memref<4x4x1xf32, #tpu.memory_space<vmem>>, %arg8: memref<4x1x1xf32, #tpu.memory_space<vmem>>, %arg9: memref<8x8xf32, #tpu.memory_space<vmem>>, %arg10: memref<4x4xf32, #tpu.memory_space<vmem>>, %arg11: memref<4x1xf32, #tpu.memory_space<vmem>>, %arg12: memref<4x4xf32, #tpu.memory_space<vmem>>, %arg13: memref<4x1xf32, #tpu.memory_space<vmem>>, %arg14: memref<1x4x1xf32, #tpu.memory_space<vmem>>) attributes {dimension_semantics = [#tpu.dimension_semantics<parallel>], iteration_bounds = array<i64: 2>, scalar_prefetch = 0 : i64, scratch_operands = 0 : i64, tpu.core_type = #tpu.core_type<tc>, window_params = [{transform_indices = @transform_0, window_bounds = array<i64: 1, 4, 100>}, {pipeline_mode = #tpu.pipeline_mode<synchronous>, transform_indices = @transform_1, window_bounds = array<i64: 4, 4>}, {pipeline_mode = #tpu.pipeline_mode<synchronous>, transform_indices = @transform_2, window_bounds = array<i64: 3, 9, 4, 4>}, {pipeline_mode = #tpu.pipeline_mode<synchronous>, transform_indices = @transform_3, window_bounds = array<i64: 9, 100, 16>}, {pipeline_mode = #tpu.pipeline_mode<synchronous>, transform_indices = @transform_4, window_bounds = array<i64: 9, 16, 8>}, {pipeline_mode = #tpu.pipeline_mode<synchronous>, transform_indices = @transform_5, window_bounds = array<i64: 9, 8, 8>}, {pipeline_mode = #tpu.pipeline_mode<synchronous>, transform_indices = @transform_6, window_bounds = array<i64: 4, 4, 1>}, {pipeline_mode = #tpu.pipeline_mode<synchronous>, transform_indices = @transform_7, window_bounds = array<i64: 4, 1, 1>}, {pipeline_mode = #tpu.pipeline_mode<synchronous>, transform_indices = @transform_8, window_bounds = array<i64: 8, 8>}, {pipeline_mode = #tpu.pipeline_mode<synchronous>, transform_indices = @transform_9, window_bounds = array<i64: 4, 4>}, {pipeline_mode = #tpu.pipeline_mode<synchronous>, transform_indices = @transform_10, window_bounds = array<i64: 4, 1>}, {pipeline_mode = #tpu.pipeline_mode<synchronous>, transform_indices = @transform_11, window_bounds = array<i64: 4, 4>}, {pipeline_mode = #tpu.pipeline_mode<synchronous>, transform_indices = @transform_12, window_bounds = array<i64: 4, 1>}, {transform_indices = @transform_13, window_bounds = array<i64: 1, 4, 1>}]} {
    %c0 = arith.constant 0 : index
    %c0_0 = arith.constant 0 : index
    %c0_1 = arith.constant 0 : index
    %0 = vector.load %arg1[%c0, %c0_0, %c0_1] : memref<1x4x100xf32, #tpu.memory_space<vmem>>, vector<1x4x100xf32>
    %1 = vector.shape_cast %0 : vector<1x4x100xf32> to vector<4x100xf32>
    %c0_2 = arith.constant 0 : index
    %c0_3 = arith.constant 0 : index
    %2 = vector.load %arg2[%c0_2, %c0_3] : memref<4x4xf32, #tpu.memory_space<vmem>>, vector<4x4xf32>
    %cst = arith.constant dense<0.000000e+00> : vector<4x100xf32>
    %3 = tpu.matmul %2, %1, %cst {dimension_numbers = #tpu.dot_dimension_numbers<[1], [0], [0], [1], [0, 0, 1, 1], [], []>} : vector<4x4xf32>, vector<4x100xf32>, vector<4x100xf32> -> vector<4x100xf32>
    %c0_4 = arith.constant 0 : index
    %c0_5 = arith.constant 0 : index
    %c0_6 = arith.constant 0 : index
    %4 = vector.load %arg7[%c0_4, %c0_5, %c0_6] : memref<4x4x1xf32, #tpu.memory_space<vmem>>, vector<1x4x1xf32>
    %5 = vector.shape_cast %4 : vector<1x4x1xf32> to vector<4x1xf32>
    %6 = vector.broadcast %5 : vector<4x1xf32> to vector<4x100xf32>
    %7 = arith.addf %3, %6 : vector<4x100xf32>
    %cst_7 = arith.constant 0.000000e+00 : f32
    %8 = vector.broadcast %cst_7 : f32 to vector<4x100xf32>
    %9 = arith.cmpf ogt, %7, %8 : vector<4x100xf32>
    %c0_8 = arith.constant 0 : index
    %c0_9 = arith.constant 0 : index
    %c0_10 = arith.constant 0 : index
    %10 = vector.load %arg8[%c0_8, %c0_9, %c0_10] : memref<4x1x1xf32, #tpu.memory_space<vmem>>, vector<1x1x1xf32>
    %11 = vector.shape_cast %10 : vector<1x1x1xf32> to vector<1x1xf32>
    %12 = vector.broadcast %11 : vector<1x1xf32> to vector<4x100xf32>
    %13 = arith.mulf %7, %12 : vector<4x100xf32>
    %14 = arith.select %9, %7, %13 : vector<4x100xi1>, vector<4x100xf32>
    %cst_11 = arith.constant 0.000000e+00 : f32
    %15 = vector.broadcast %cst_11 : f32 to vector<4x16xf32>
    %c0_12 = arith.constant 0 : index
    %c0_13 = arith.constant 0 : index
    %c0_14 = arith.constant 0 : index
    %16 = vector.load %arg4[%c0_12, %c0_13, %c0_14] : memref<9x100x16xf32, #tpu.memory_space<vmem>>, vector<1x100x16xf32>
    %17 = vector.shape_cast %16 : vector<1x100x16xf32> to vector<100x16xf32>
    %cst_15 = arith.constant dense<0.000000e+00> : vector<4x16xf32>
    %18 = tpu.matmul %14, %17, %cst_15 {dimension_numbers = #tpu.dot_dimension_numbers<[1], [0], [0], [1], [0, 0, 1, 1], [], []>} : vector<4x100xf32>, vector<100x16xf32>, vector<4x16xf32> -> vector<4x16xf32>
    %c0_16 = arith.constant 0 : index
    %c0_17 = arith.constant 0 : index
    %c0_18 = arith.constant 0 : index
    %c0_19 = arith.constant 0 : index
    %19 = vector.load %arg3[%c0_16, %c0_17, %c0_18, %c0_19] : memref<3x9x4x4xf32, #tpu.memory_space<vmem>>, vector<1x1x4x4xf32>
    %20 = vector.shape_cast %19 : vector<1x1x4x4xf32> to vector<4x4xf32>
    %cst_20 = arith.constant dense<0.000000e+00> : vector<4x16xf32>
    %21 = tpu.matmul %20, %18, %cst_20 {dimension_numbers = #tpu.dot_dimension_numbers<[1], [0], [0], [1], [0, 0, 1, 1], [], []>} : vector<4x4xf32>, vector<4x16xf32>, vector<4x16xf32> -> vector<4x16xf32>
    %22 = arith.addf %15, %21 : vector<4x16xf32>
    %c1 = arith.constant 1 : index
    %c0_21 = arith.constant 0 : index
    %c0_22 = arith.constant 0 : index
    %23 = vector.load %arg4[%c1, %c0_21, %c0_22] : memref<9x100x16xf32, #tpu.memory_space<vmem>>, vector<1x100x16xf32>
    %24 = vector.shape_cast %23 : vector<1x100x16xf32> to vector<100x16xf32>
    %cst_23 = arith.constant dense<0.000000e+00> : vector<4x16xf32>
    %25 = tpu.matmul %14, %24, %cst_23 {dimension_numbers = #tpu.dot_dimension_numbers<[1], [0], [0], [1], [0, 0, 1, 1], [], []>} : vector<4x100xf32>, vector<100x16xf32>, vector<4x16xf32> -> vector<4x16xf32>
    %c0_24 = arith.constant 0 : index
    %c1_25 = arith.constant 1 : index
    %c0_26 = arith.constant 0 : index
    %c0_27 = arith.constant 0 : index
    %26 = vector.load %arg3[%c0_24, %c1_25, %c0_26, %c0_27] : memref<3x9x4x4xf32, #tpu.memory_space<vmem>>, vector<1x1x4x4xf32>
    %27 = vector.shape_cast %26 : vector<1x1x4x4xf32> to vector<4x4xf32>
    %cst_28 = arith.constant dense<0.000000e+00> : vector<4x16xf32>
    %28 = tpu.matmul %27, %25, %cst_28 {dimension_numbers = #tpu.dot_dimension_numbers<[1], [0], [0], [1], [0, 0, 1, 1], [], []>} : vector<4x4xf32>, vector<4x16xf32>, vector<4x16xf32> -> vector<4x16xf32>
    %29 = arith.addf %22, %28 : vector<4x16xf32>
    %c2 = arith.constant 2 : index
    %c0_29 = arith.constant 0 : index
    %c0_30 = arith.constant 0 : index
    %30 = vector.load %arg4[%c2, %c0_29, %c0_30] : memref<9x100x16xf32, #tpu.memory_space<vmem>>, vector<1x100x16xf32>
    %31 = vector.shape_cast %30 : vector<1x100x16xf32> to vector<100x16xf32>
    %cst_31 = arith.constant dense<0.000000e+00> : vector<4x16xf32>
    %32 = tpu.matmul %14, %31, %cst_31 {dimension_numbers = #tpu.dot_dimension_numbers<[1], [0], [0], [1], [0, 0, 1, 1], [], []>} : vector<4x100xf32>, vector<100x16xf32>, vector<4x16xf32> -> vector<4x16xf32>
    %c0_32 = arith.constant 0 : index
    %c2_33 = arith.constant 2 : index
    %c0_34 = arith.constant 0 : index
    %c0_35 = arith.constant 0 : index
    %33 = vector.load %arg3[%c0_32, %c2_33, %c0_34, %c0_35] : memref<3x9x4x4xf32, #tpu.memory_space<vmem>>, vector<1x1x4x4xf32>
    %34 = vector.shape_cast %33 : vector<1x1x4x4xf32> to vector<4x4xf32>
    %cst_36 = arith.constant dense<0.000000e+00> : vector<4x16xf32>
    %35 = tpu.matmul %34, %32, %cst_36 {dimension_numbers = #tpu.dot_dimension_numbers<[1], [0], [0], [1], [0, 0, 1, 1], [], []>} : vector<4x4xf32>, vector<4x16xf32>, vector<4x16xf32> -> vector<4x16xf32>
    %36 = arith.addf %29, %35 : vector<4x16xf32>
    %c3 = arith.constant 3 : index
    %c0_37 = arith.constant 0 : index
    %c0_38 = arith.constant 0 : index
    %37 = vector.load %arg4[%c3, %c0_37, %c0_38] : memref<9x100x16xf32, #tpu.memory_space<vmem>>, vector<1x100x16xf32>
    %38 = vector.shape_cast %37 : vector<1x100x16xf32> to vector<100x16xf32>
    %cst_39 = arith.constant dense<0.000000e+00> : vector<4x16xf32>
    %39 = tpu.matmul %14, %38, %cst_39 {dimension_numbers = #tpu.dot_dimension_numbers<[1], [0], [0], [1], [0, 0, 1, 1], [], []>} : vector<4x100xf32>, vector<100x16xf32>, vector<4x16xf32> -> vector<4x16xf32>
    %c0_40 = arith.constant 0 : index
    %c3_41 = arith.constant 3 : index
    %c0_42 = arith.constant 0 : index
    %c0_43 = arith.constant 0 : index
    %40 = vector.load %arg3[%c0_40, %c3_41, %c0_42, %c0_43] : memref<3x9x4x4xf32, #tpu.memory_space<vmem>>, vector<1x1x4x4xf32>
    %41 = vector.shape_cast %40 : vector<1x1x4x4xf32> to vector<4x4xf32>
    %cst_44 = arith.constant dense<0.000000e+00> : vector<4x16xf32>
    %42 = tpu.matmul %41, %39, %cst_44 {dimension_numbers = #tpu.dot_dimension_numbers<[1], [0], [0], [1], [0, 0, 1, 1], [], []>} : vector<4x4xf32>, vector<4x16xf32>, vector<4x16xf32> -> vector<4x16xf32>
    %43 = arith.addf %36, %42 : vector<4x16xf32>
    %c4 = arith.constant 4 : index
    %c0_45 = arith.constant 0 : index
    %c0_46 = arith.constant 0 : index
    %44 = vector.load %arg4[%c4, %c0_45, %c0_46] : memref<9x100x16xf32, #tpu.memory_space<vmem>>, vector<1x100x16xf32>
    %45 = vector.shape_cast %44 : vector<1x100x16xf32> to vector<100x16xf32>
    %cst_47 = arith.constant dense<0.000000e+00> : vector<4x16xf32>
    %46 = tpu.matmul %14, %45, %cst_47 {dimension_numbers = #tpu.dot_dimension_numbers<[1], [0], [0], [1], [0, 0, 1, 1], [], []>} : vector<4x100xf32>, vector<100x16xf32>, vector<4x16xf32> -> vector<4x16xf32>
    %c0_48 = arith.constant 0 : index
    %c4_49 = arith.constant 4 : index
    %c0_50 = arith.constant 0 : index
    %c0_51 = arith.constant 0 : index
    %47 = vector.load %arg3[%c0_48, %c4_49, %c0_50, %c0_51] : memref<3x9x4x4xf32, #tpu.memory_space<vmem>>, vector<1x1x4x4xf32>
    %48 = vector.shape_cast %47 : vector<1x1x4x4xf32> to vector<4x4xf32>
    %cst_52 = arith.constant dense<0.000000e+00> : vector<4x16xf32>
    %49 = tpu.matmul %48, %46, %cst_52 {dimension_numbers = #tpu.dot_dimension_numbers<[1], [0], [0], [1], [0, 0, 1, 1], [], []>} : vector<4x4xf32>, vector<4x16xf32>, vector<4x16xf32> -> vector<4x16xf32>
    %50 = arith.addf %43, %49 : vector<4x16xf32>
    %c5 = arith.constant 5 : index
    %c0_53 = arith.constant 0 : index
    %c0_54 = arith.constant 0 : index
    %51 = vector.load %arg4[%c5, %c0_53, %c0_54] : memref<9x100x16xf32, #tpu.memory_space<vmem>>, vector<1x100x16xf32>
    %52 = vector.shape_cast %51 : vector<1x100x16xf32> to vector<100x16xf32>
    %cst_55 = arith.constant dense<0.000000e+00> : vector<4x16xf32>
    %53 = tpu.matmul %14, %52, %cst_55 {dimension_numbers = #tpu.dot_dimension_numbers<[1], [0], [0], [1], [0, 0, 1, 1], [], []>} : vector<4x100xf32>, vector<100x16xf32>, vector<4x16xf32> -> vector<4x16xf32>
    %c0_56 = arith.constant 0 : index
    %c5_57 = arith.constant 5 : index
    %c0_58 = arith.constant 0 : index
    %c0_59 = arith.constant 0 : index
    %54 = vector.load %arg3[%c0_56, %c5_57, %c0_58, %c0_59] : memref<3x9x4x4xf32, #tpu.memory_space<vmem>>, vector<1x1x4x4xf32>
    %55 = vector.shape_cast %54 : vector<1x1x4x4xf32> to vector<4x4xf32>
    %cst_60 = arith.constant dense<0.000000e+00> : vector<4x16xf32>
    %56 = tpu.matmul %55, %53, %cst_60 {dimension_numbers = #tpu.dot_dimension_numbers<[1], [0], [0], [1], [0, 0, 1, 1], [], []>} : vector<4x4xf32>, vector<4x16xf32>, vector<4x16xf32> -> vector<4x16xf32>
    %57 = arith.addf %50, %56 : vector<4x16xf32>
    %c6 = arith.constant 6 : index
    %c0_61 = arith.constant 0 : index
    %c0_62 = arith.constant 0 : index
    %58 = vector.load %arg4[%c6, %c0_61, %c0_62] : memref<9x100x16xf32, #tpu.memory_space<vmem>>, vector<1x100x16xf32>
    %59 = vector.shape_cast %58 : vector<1x100x16xf32> to vector<100x16xf32>
    %cst_63 = arith.constant dense<0.000000e+00> : vector<4x16xf32>
    %60 = tpu.matmul %14, %59, %cst_63 {dimension_numbers = #tpu.dot_dimension_numbers<[1], [0], [0], [1], [0, 0, 1, 1], [], []>} : vector<4x100xf32>, vector<100x16xf32>, vector<4x16xf32> -> vector<4x16xf32>
    %c0_64 = arith.constant 0 : index
    %c6_65 = arith.constant 6 : index
    %c0_66 = arith.constant 0 : index
    %c0_67 = arith.constant 0 : index
    %61 = vector.load %arg3[%c0_64, %c6_65, %c0_66, %c0_67] : memref<3x9x4x4xf32, #tpu.memory_space<vmem>>, vector<1x1x4x4xf32>
    %62 = vector.shape_cast %61 : vector<1x1x4x4xf32> to vector<4x4xf32>
    %cst_68 = arith.constant dense<0.000000e+00> : vector<4x16xf32>
    %63 = tpu.matmul %62, %60, %cst_68 {dimension_numbers = #tpu.dot_dimension_numbers<[1], [0], [0], [1], [0, 0, 1, 1], [], []>} : vector<4x4xf32>, vector<4x16xf32>, vector<4x16xf32> -> vector<4x16xf32>
    %64 = arith.addf %57, %63 : vector<4x16xf32>
    %c7 = arith.constant 7 : index
    %c0_69 = arith.constant 0 : index
    %c0_70 = arith.constant 0 : index
    %65 = vector.load %arg4[%c7, %c0_69, %c0_70] : memref<9x100x16xf32, #tpu.memory_space<vmem>>, vector<1x100x16xf32>
    %66 = vector.shape_cast %65 : vector<1x100x16xf32> to vector<100x16xf32>
    %cst_71 = arith.constant dense<0.000000e+00> : vector<4x16xf32>
    %67 = tpu.matmul %14, %66, %cst_71 {dimension_numbers = #tpu.dot_dimension_numbers<[1], [0], [0], [1], [0, 0, 1, 1], [], []>} : vector<4x100xf32>, vector<100x16xf32>, vector<4x16xf32> -> vector<4x16xf32>
    %c0_72 = arith.constant 0 : index
    %c7_73 = arith.constant 7 : index
    %c0_74 = arith.constant 0 : index
    %c0_75 = arith.constant 0 : index
    %68 = vector.load %arg3[%c0_72, %c7_73, %c0_74, %c0_75] : memref<3x9x4x4xf32, #tpu.memory_space<vmem>>, vector<1x1x4x4xf32>
    %69 = vector.shape_cast %68 : vector<1x1x4x4xf32> to vector<4x4xf32>
    %cst_76 = arith.constant dense<0.000000e+00> : vector<4x16xf32>
    %70 = tpu.matmul %69, %67, %cst_76 {dimension_numbers = #tpu.dot_dimension_numbers<[1], [0], [0], [1], [0, 0, 1, 1], [], []>} : vector<4x4xf32>, vector<4x16xf32>, vector<4x16xf32> -> vector<4x16xf32>
    %71 = arith.addf %64, %70 : vector<4x16xf32>
    %c8 = arith.constant 8 : index
    %c0_77 = arith.constant 0 : index
    %c0_78 = arith.constant 0 : index
    %72 = vector.load %arg4[%c8, %c0_77, %c0_78] : memref<9x100x16xf32, #tpu.memory_space<vmem>>, vector<1x100x16xf32>
    %73 = vector.shape_cast %72 : vector<1x100x16xf32> to vector<100x16xf32>
    %cst_79 = arith.constant dense<0.000000e+00> : vector<4x16xf32>
    %74 = tpu.matmul %14, %73, %cst_79 {dimension_numbers = #tpu.dot_dimension_numbers<[1], [0], [0], [1], [0, 0, 1, 1], [], []>} : vector<4x100xf32>, vector<100x16xf32>, vector<4x16xf32> -> vector<4x16xf32>
    %c0_80 = arith.constant 0 : index
    %c8_81 = arith.constant 8 : index
    %c0_82 = arith.constant 0 : index
    %c0_83 = arith.constant 0 : index
    %75 = vector.load %arg3[%c0_80, %c8_81, %c0_82, %c0_83] : memref<3x9x4x4xf32, #tpu.memory_space<vmem>>, vector<1x1x4x4xf32>
    %76 = vector.shape_cast %75 : vector<1x1x4x4xf32> to vector<4x4xf32>
    %cst_84 = arith.constant dense<0.000000e+00> : vector<4x16xf32>
    %77 = tpu.matmul %76, %74, %cst_84 {dimension_numbers = #tpu.dot_dimension_numbers<[1], [0], [0], [1], [0, 0, 1, 1], [], []>} : vector<4x4xf32>, vector<4x16xf32>, vector<4x16xf32> -> vector<4x16xf32>
    %78 = arith.addf %71, %77 : vector<4x16xf32>
    %c1_85 = arith.constant 1 : index
    %c0_86 = arith.constant 0 : index
    %c0_87 = arith.constant 0 : index
    %79 = vector.load %arg7[%c1_85, %c0_86, %c0_87] : memref<4x4x1xf32, #tpu.memory_space<vmem>>, vector<1x4x1xf32>
    %80 = vector.shape_cast %79 : vector<1x4x1xf32> to vector<4x1xf32>
    %81 = vector.broadcast %80 : vector<4x1xf32> to vector<4x16xf32>
    %82 = arith.addf %78, %81 : vector<4x16xf32>
    %cst_88 = arith.constant 0.000000e+00 : f32
    %83 = vector.broadcast %cst_88 : f32 to vector<4x16xf32>
    %84 = arith.cmpf ogt, %82, %83 : vector<4x16xf32>
    %c1_89 = arith.constant 1 : index
    %c0_90 = arith.constant 0 : index
    %c0_91 = arith.constant 0 : index
    %85 = vector.load %arg8[%c1_89, %c0_90, %c0_91] : memref<4x1x1xf32, #tpu.memory_space<vmem>>, vector<1x1x1xf32>
    %86 = vector.shape_cast %85 : vector<1x1x1xf32> to vector<1x1xf32>
    %87 = vector.broadcast %86 : vector<1x1xf32> to vector<4x16xf32>
    %88 = arith.mulf %82, %87 : vector<4x16xf32>
    %89 = arith.select %84, %82, %88 : vector<4x16xi1>, vector<4x16xf32>
    %cst_92 = arith.constant 0.000000e+00 : f32
    %90 = vector.broadcast %cst_92 : f32 to vector<4x8xf32>
    %c0_93 = arith.constant 0 : index
    %c0_94 = arith.constant 0 : index
    %c0_95 = arith.constant 0 : index
    %91 = vector.load %arg5[%c0_93, %c0_94, %c0_95] : memref<9x16x8xf32, #tpu.memory_space<vmem>>, vector<1x16x8xf32>
    %92 = vector.shape_cast %91 : vector<1x16x8xf32> to vector<16x8xf32>
    %cst_96 = arith.constant dense<0.000000e+00> : vector<4x8xf32>
    %93 = tpu.matmul %89, %92, %cst_96 {dimension_numbers = #tpu.dot_dimension_numbers<[1], [0], [0], [1], [0, 0, 1, 1], [], []>} : vector<4x16xf32>, vector<16x8xf32>, vector<4x8xf32> -> vector<4x8xf32>
    %c1_97 = arith.constant 1 : index
    %c0_98 = arith.constant 0 : index
    %c0_99 = arith.constant 0 : index
    %c0_100 = arith.constant 0 : index
    %94 = vector.load %arg3[%c1_97, %c0_98, %c0_99, %c0_100] : memref<3x9x4x4xf32, #tpu.memory_space<vmem>>, vector<1x1x4x4xf32>
    %95 = vector.shape_cast %94 : vector<1x1x4x4xf32> to vector<4x4xf32>
    %cst_101 = arith.constant dense<0.000000e+00> : vector<4x8xf32>
    %96 = tpu.matmul %95, %93, %cst_101 {dimension_numbers = #tpu.dot_dimension_numbers<[1], [0], [0], [1], [0, 0, 1, 1], [], []>} : vector<4x4xf32>, vector<4x8xf32>, vector<4x8xf32> -> vector<4x8xf32>
    %97 = arith.addf %90, %96 : vector<4x8xf32>
    %c1_102 = arith.constant 1 : index
    %c0_103 = arith.constant 0 : index
    %c0_104 = arith.constant 0 : index
    %98 = vector.load %arg5[%c1_102, %c0_103, %c0_104] : memref<9x16x8xf32, #tpu.memory_space<vmem>>, vector<1x16x8xf32>
    %99 = vector.shape_cast %98 : vector<1x16x8xf32> to vector<16x8xf32>
    %cst_105 = arith.constant dense<0.000000e+00> : vector<4x8xf32>
    %100 = tpu.matmul %89, %99, %cst_105 {dimension_numbers = #tpu.dot_dimension_numbers<[1], [0], [0], [1], [0, 0, 1, 1], [], []>} : vector<4x16xf32>, vector<16x8xf32>, vector<4x8xf32> -> vector<4x8xf32>
    %c1_106 = arith.constant 1 : index
    %c1_107 = arith.constant 1 : index
    %c0_108 = arith.constant 0 : index
    %c0_109 = arith.constant 0 : index
    %101 = vector.load %arg3[%c1_106, %c1_107, %c0_108, %c0_109] : memref<3x9x4x4xf32, #tpu.memory_space<vmem>>, vector<1x1x4x4xf32>
    %102 = vector.shape_cast %101 : vector<1x1x4x4xf32> to vector<4x4xf32>
    %cst_110 = arith.constant dense<0.000000e+00> : vector<4x8xf32>
    %103 = tpu.matmul %102, %100, %cst_110 {dimension_numbers = #tpu.dot_dimension_numbers<[1], [0], [0], [1], [0, 0, 1, 1], [], []>} : vector<4x4xf32>, vector<4x8xf32>, vector<4x8xf32> -> vector<4x8xf32>
    %104 = arith.addf %97, %103 : vector<4x8xf32>
    %c2_111 = arith.constant 2 : index
    %c0_112 = arith.constant 0 : index
    %c0_113 = arith.constant 0 : index
    %105 = vector.load %arg5[%c2_111, %c0_112, %c0_113] : memref<9x16x8xf32, #tpu.memory_space<vmem>>, vector<1x16x8xf32>
    %106 = vector.shape_cast %105 : vector<1x16x8xf32> to vector<16x8xf32>
    %cst_114 = arith.constant dense<0.000000e+00> : vector<4x8xf32>
    %107 = tpu.matmul %89, %106, %cst_114 {dimension_numbers = #tpu.dot_dimension_numbers<[1], [0], [0], [1], [0, 0, 1, 1], [], []>} : vector<4x16xf32>, vector<16x8xf32>, vector<4x8xf32> -> vector<4x8xf32>
    %c1_115 = arith.constant 1 : index
    %c2_116 = arith.constant 2 : index
    %c0_117 = arith.constant 0 : index
    %c0_118 = arith.constant 0 : index
    %108 = vector.load %arg3[%c1_115, %c2_116, %c0_117, %c0_118] : memref<3x9x4x4xf32, #tpu.memory_space<vmem>>, vector<1x1x4x4xf32>
    %109 = vector.shape_cast %108 : vector<1x1x4x4xf32> to vector<4x4xf32>
    %cst_119 = arith.constant dense<0.000000e+00> : vector<4x8xf32>
    %110 = tpu.matmul %109, %107, %cst_119 {dimension_numbers = #tpu.dot_dimension_numbers<[1], [0], [0], [1], [0, 0, 1, 1], [], []>} : vector<4x4xf32>, vector<4x8xf32>, vector<4x8xf32> -> vector<4x8xf32>
    %111 = arith.addf %104, %110 : vector<4x8xf32>
    %c3_120 = arith.constant 3 : index
    %c0_121 = arith.constant 0 : index
    %c0_122 = arith.constant 0 : index
    %112 = vector.load %arg5[%c3_120, %c0_121, %c0_122] : memref<9x16x8xf32, #tpu.memory_space<vmem>>, vector<1x16x8xf32>
    %113 = vector.shape_cast %112 : vector<1x16x8xf32> to vector<16x8xf32>
    %cst_123 = arith.constant dense<0.000000e+00> : vector<4x8xf32>
    %114 = tpu.matmul %89, %113, %cst_123 {dimension_numbers = #tpu.dot_dimension_numbers<[1], [0], [0], [1], [0, 0, 1, 1], [], []>} : vector<4x16xf32>, vector<16x8xf32>, vector<4x8xf32> -> vector<4x8xf32>
    %c1_124 = arith.constant 1 : index
    %c3_125 = arith.constant 3 : index
    %c0_126 = arith.constant 0 : index
    %c0_127 = arith.constant 0 : index
    %115 = vector.load %arg3[%c1_124, %c3_125, %c0_126, %c0_127] : memref<3x9x4x4xf32, #tpu.memory_space<vmem>>, vector<1x1x4x4xf32>
    %116 = vector.shape_cast %115 : vector<1x1x4x4xf32> to vector<4x4xf32>
    %cst_128 = arith.constant dense<0.000000e+00> : vector<4x8xf32>
    %117 = tpu.matmul %116, %114, %cst_128 {dimension_numbers = #tpu.dot_dimension_numbers<[1], [0], [0], [1], [0, 0, 1, 1], [], []>} : vector<4x4xf32>, vector<4x8xf32>, vector<4x8xf32> -> vector<4x8xf32>
    %118 = arith.addf %111, %117 : vector<4x8xf32>
    %c4_129 = arith.constant 4 : index
    %c0_130 = arith.constant 0 : index
    %c0_131 = arith.constant 0 : index
    %119 = vector.load %arg5[%c4_129, %c0_130, %c0_131] : memref<9x16x8xf32, #tpu.memory_space<vmem>>, vector<1x16x8xf32>
    %120 = vector.shape_cast %119 : vector<1x16x8xf32> to vector<16x8xf32>
    %cst_132 = arith.constant dense<0.000000e+00> : vector<4x8xf32>
    %121 = tpu.matmul %89, %120, %cst_132 {dimension_numbers = #tpu.dot_dimension_numbers<[1], [0], [0], [1], [0, 0, 1, 1], [], []>} : vector<4x16xf32>, vector<16x8xf32>, vector<4x8xf32> -> vector<4x8xf32>
    %c1_133 = arith.constant 1 : index
    %c4_134 = arith.constant 4 : index
    %c0_135 = arith.constant 0 : index
    %c0_136 = arith.constant 0 : index
    %122 = vector.load %arg3[%c1_133, %c4_134, %c0_135, %c0_136] : memref<3x9x4x4xf32, #tpu.memory_space<vmem>>, vector<1x1x4x4xf32>
    %123 = vector.shape_cast %122 : vector<1x1x4x4xf32> to vector<4x4xf32>
    %cst_137 = arith.constant dense<0.000000e+00> : vector<4x8xf32>
    %124 = tpu.matmul %123, %121, %cst_137 {dimension_numbers = #tpu.dot_dimension_numbers<[1], [0], [0], [1], [0, 0, 1, 1], [], []>} : vector<4x4xf32>, vector<4x8xf32>, vector<4x8xf32> -> vector<4x8xf32>
    %125 = arith.addf %118, %124 : vector<4x8xf32>
    %c5_138 = arith.constant 5 : index
    %c0_139 = arith.constant 0 : index
    %c0_140 = arith.constant 0 : index
    %126 = vector.load %arg5[%c5_138, %c0_139, %c0_140] : memref<9x16x8xf32, #tpu.memory_space<vmem>>, vector<1x16x8xf32>
    %127 = vector.shape_cast %126 : vector<1x16x8xf32> to vector<16x8xf32>
    %cst_141 = arith.constant dense<0.000000e+00> : vector<4x8xf32>
    %128 = tpu.matmul %89, %127, %cst_141 {dimension_numbers = #tpu.dot_dimension_numbers<[1], [0], [0], [1], [0, 0, 1, 1], [], []>} : vector<4x16xf32>, vector<16x8xf32>, vector<4x8xf32> -> vector<4x8xf32>
    %c1_142 = arith.constant 1 : index
    %c5_143 = arith.constant 5 : index
    %c0_144 = arith.constant 0 : index
    %c0_145 = arith.constant 0 : index
    %129 = vector.load %arg3[%c1_142, %c5_143, %c0_144, %c0_145] : memref<3x9x4x4xf32, #tpu.memory_space<vmem>>, vector<1x1x4x4xf32>
    %130 = vector.shape_cast %129 : vector<1x1x4x4xf32> to vector<4x4xf32>
    %cst_146 = arith.constant dense<0.000000e+00> : vector<4x8xf32>
    %131 = tpu.matmul %130, %128, %cst_146 {dimension_numbers = #tpu.dot_dimension_numbers<[1], [0], [0], [1], [0, 0, 1, 1], [], []>} : vector<4x4xf32>, vector<4x8xf32>, vector<4x8xf32> -> vector<4x8xf32>
    %132 = arith.addf %125, %131 : vector<4x8xf32>
    %c6_147 = arith.constant 6 : index
    %c0_148 = arith.constant 0 : index
    %c0_149 = arith.constant 0 : index
    %133 = vector.load %arg5[%c6_147, %c0_148, %c0_149] : memref<9x16x8xf32, #tpu.memory_space<vmem>>, vector<1x16x8xf32>
    %134 = vector.shape_cast %133 : vector<1x16x8xf32> to vector<16x8xf32>
    %cst_150 = arith.constant dense<0.000000e+00> : vector<4x8xf32>
    %135 = tpu.matmul %89, %134, %cst_150 {dimension_numbers = #tpu.dot_dimension_numbers<[1], [0], [0], [1], [0, 0, 1, 1], [], []>} : vector<4x16xf32>, vector<16x8xf32>, vector<4x8xf32> -> vector<4x8xf32>
    %c1_151 = arith.constant 1 : index
    %c6_152 = arith.constant 6 : index
    %c0_153 = arith.constant 0 : index
    %c0_154 = arith.constant 0 : index
    %136 = vector.load %arg3[%c1_151, %c6_152, %c0_153, %c0_154] : memref<3x9x4x4xf32, #tpu.memory_space<vmem>>, vector<1x1x4x4xf32>
    %137 = vector.shape_cast %136 : vector<1x1x4x4xf32> to vector<4x4xf32>
    %cst_155 = arith.constant dense<0.000000e+00> : vector<4x8xf32>
    %138 = tpu.matmul %137, %135, %cst_155 {dimension_numbers = #tpu.dot_dimension_numbers<[1], [0], [0], [1], [0, 0, 1, 1], [], []>} : vector<4x4xf32>, vector<4x8xf32>, vector<4x8xf32> -> vector<4x8xf32>
    %139 = arith.addf %132, %138 : vector<4x8xf32>
    %c7_156 = arith.constant 7 : index
    %c0_157 = arith.constant 0 : index
    %c0_158 = arith.constant 0 : index
    %140 = vector.load %arg5[%c7_156, %c0_157, %c0_158] : memref<9x16x8xf32, #tpu.memory_space<vmem>>, vector<1x16x8xf32>
    %141 = vector.shape_cast %140 : vector<1x16x8xf32> to vector<16x8xf32>
    %cst_159 = arith.constant dense<0.000000e+00> : vector<4x8xf32>
    %142 = tpu.matmul %89, %141, %cst_159 {dimension_numbers = #tpu.dot_dimension_numbers<[1], [0], [0], [1], [0, 0, 1, 1], [], []>} : vector<4x16xf32>, vector<16x8xf32>, vector<4x8xf32> -> vector<4x8xf32>
    %c1_160 = arith.constant 1 : index
    %c7_161 = arith.constant 7 : index
    %c0_162 = arith.constant 0 : index
    %c0_163 = arith.constant 0 : index
    %143 = vector.load %arg3[%c1_160, %c7_161, %c0_162, %c0_163] : memref<3x9x4x4xf32, #tpu.memory_space<vmem>>, vector<1x1x4x4xf32>
    %144 = vector.shape_cast %143 : vector<1x1x4x4xf32> to vector<4x4xf32>
    %cst_164 = arith.constant dense<0.000000e+00> : vector<4x8xf32>
    %145 = tpu.matmul %144, %142, %cst_164 {dimension_numbers = #tpu.dot_dimension_numbers<[1], [0], [0], [1], [0, 0, 1, 1], [], []>} : vector<4x4xf32>, vector<4x8xf32>, vector<4x8xf32> -> vector<4x8xf32>
    %146 = arith.addf %139, %145 : vector<4x8xf32>
    %c8_165 = arith.constant 8 : index
    %c0_166 = arith.constant 0 : index
    %c0_167 = arith.constant 0 : index
    %147 = vector.load %arg5[%c8_165, %c0_166, %c0_167] : memref<9x16x8xf32, #tpu.memory_space<vmem>>, vector<1x16x8xf32>
    %148 = vector.shape_cast %147 : vector<1x16x8xf32> to vector<16x8xf32>
    %cst_168 = arith.constant dense<0.000000e+00> : vector<4x8xf32>
    %149 = tpu.matmul %89, %148, %cst_168 {dimension_numbers = #tpu.dot_dimension_numbers<[1], [0], [0], [1], [0, 0, 1, 1], [], []>} : vector<4x16xf32>, vector<16x8xf32>, vector<4x8xf32> -> vector<4x8xf32>
    %c1_169 = arith.constant 1 : index
    %c8_170 = arith.constant 8 : index
    %c0_171 = arith.constant 0 : index
    %c0_172 = arith.constant 0 : index
    %150 = vector.load %arg3[%c1_169, %c8_170, %c0_171, %c0_172] : memref<3x9x4x4xf32, #tpu.memory_space<vmem>>, vector<1x1x4x4xf32>
    %151 = vector.shape_cast %150 : vector<1x1x4x4xf32> to vector<4x4xf32>
    %cst_173 = arith.constant dense<0.000000e+00> : vector<4x8xf32>
    %152 = tpu.matmul %151, %149, %cst_173 {dimension_numbers = #tpu.dot_dimension_numbers<[1], [0], [0], [1], [0, 0, 1, 1], [], []>} : vector<4x4xf32>, vector<4x8xf32>, vector<4x8xf32> -> vector<4x8xf32>
    %153 = arith.addf %146, %152 : vector<4x8xf32>
    %c2_174 = arith.constant 2 : index
    %c0_175 = arith.constant 0 : index
    %c0_176 = arith.constant 0 : index
    %154 = vector.load %arg7[%c2_174, %c0_175, %c0_176] : memref<4x4x1xf32, #tpu.memory_space<vmem>>, vector<1x4x1xf32>
    %155 = vector.shape_cast %154 : vector<1x4x1xf32> to vector<4x1xf32>
    %156 = vector.broadcast %155 : vector<4x1xf32> to vector<4x8xf32>
    %157 = arith.addf %153, %156 : vector<4x8xf32>
    %cst_177 = arith.constant 0.000000e+00 : f32
    %158 = vector.broadcast %cst_177 : f32 to vector<4x8xf32>
    %159 = arith.cmpf ogt, %157, %158 : vector<4x8xf32>
    %c2_178 = arith.constant 2 : index
    %c0_179 = arith.constant 0 : index
    %c0_180 = arith.constant 0 : index
    %160 = vector.load %arg8[%c2_178, %c0_179, %c0_180] : memref<4x1x1xf32, #tpu.memory_space<vmem>>, vector<1x1x1xf32>
    %161 = vector.shape_cast %160 : vector<1x1x1xf32> to vector<1x1xf32>
    %162 = vector.broadcast %161 : vector<1x1xf32> to vector<4x8xf32>
    %163 = arith.mulf %157, %162 : vector<4x8xf32>
    %164 = arith.select %159, %157, %163 : vector<4x8xi1>, vector<4x8xf32>
    %cst_181 = arith.constant 0.000000e+00 : f32
    %165 = vector.broadcast %cst_181 : f32 to vector<4x8xf32>
    %c0_182 = arith.constant 0 : index
    %c0_183 = arith.constant 0 : index
    %c0_184 = arith.constant 0 : index
    %166 = vector.load %arg6[%c0_182, %c0_183, %c0_184] : memref<9x8x8xf32, #tpu.memory_space<vmem>>, vector<1x8x8xf32>
    %167 = vector.shape_cast %166 : vector<1x8x8xf32> to vector<8x8xf32>
    %cst_185 = arith.constant dense<0.000000e+00> : vector<4x8xf32>
    %168 = tpu.matmul %164, %167, %cst_185 {dimension_numbers = #tpu.dot_dimension_numbers<[1], [0], [0], [1], [0, 0, 1, 1], [], []>} : vector<4x8xf32>, vector<8x8xf32>, vector<4x8xf32> -> vector<4x8xf32>
    %c2_186 = arith.constant 2 : index
    %c0_187 = arith.constant 0 : index
    %c0_188 = arith.constant 0 : index
    %c0_189 = arith.constant 0 : index
    %169 = vector.load %arg3[%c2_186, %c0_187, %c0_188, %c0_189] : memref<3x9x4x4xf32, #tpu.memory_space<vmem>>, vector<1x1x4x4xf32>
    %170 = vector.shape_cast %169 : vector<1x1x4x4xf32> to vector<4x4xf32>
    %cst_190 = arith.constant dense<0.000000e+00> : vector<4x8xf32>
    %171 = tpu.matmul %170, %168, %cst_190 {dimension_numbers = #tpu.dot_dimension_numbers<[1], [0], [0], [1], [0, 0, 1, 1], [], []>} : vector<4x4xf32>, vector<4x8xf32>, vector<4x8xf32> -> vector<4x8xf32>
    %172 = arith.addf %165, %171 : vector<4x8xf32>
    %c1_191 = arith.constant 1 : index
    %c0_192 = arith.constant 0 : index
    %c0_193 = arith.constant 0 : index
    %173 = vector.load %arg6[%c1_191, %c0_192, %c0_193] : memref<9x8x8xf32, #tpu.memory_space<vmem>>, vector<1x8x8xf32>
    %174 = vector.shape_cast %173 : vector<1x8x8xf32> to vector<8x8xf32>
    %cst_194 = arith.constant dense<0.000000e+00> : vector<4x8xf32>
    %175 = tpu.matmul %164, %174, %cst_194 {dimension_numbers = #tpu.dot_dimension_numbers<[1], [0], [0], [1], [0, 0, 1, 1], [], []>} : vector<4x8xf32>, vector<8x8xf32>, vector<4x8xf32> -> vector<4x8xf32>
    %c2_195 = arith.constant 2 : index
    %c1_196 = arith.constant 1 : index
    %c0_197 = arith.constant 0 : index
    %c0_198 = arith.constant 0 : index
    %176 = vector.load %arg3[%c2_195, %c1_196, %c0_197, %c0_198] : memref<3x9x4x4xf32, #tpu.memory_space<vmem>>, vector<1x1x4x4xf32>
    %177 = vector.shape_cast %176 : vector<1x1x4x4xf32> to vector<4x4xf32>
    %cst_199 = arith.constant dense<0.000000e+00> : vector<4x8xf32>
    %178 = tpu.matmul %177, %175, %cst_199 {dimension_numbers = #tpu.dot_dimension_numbers<[1], [0], [0], [1], [0, 0, 1, 1], [], []>} : vector<4x4xf32>, vector<4x8xf32>, vector<4x8xf32> -> vector<4x8xf32>
    %179 = arith.addf %172, %178 : vector<4x8xf32>
    %c2_200 = arith.constant 2 : index
    %c0_201 = arith.constant 0 : index
    %c0_202 = arith.constant 0 : index
    %180 = vector.load %arg6[%c2_200, %c0_201, %c0_202] : memref<9x8x8xf32, #tpu.memory_space<vmem>>, vector<1x8x8xf32>
    %181 = vector.shape_cast %180 : vector<1x8x8xf32> to vector<8x8xf32>
    %cst_203 = arith.constant dense<0.000000e+00> : vector<4x8xf32>
    %182 = tpu.matmul %164, %181, %cst_203 {dimension_numbers = #tpu.dot_dimension_numbers<[1], [0], [0], [1], [0, 0, 1, 1], [], []>} : vector<4x8xf32>, vector<8x8xf32>, vector<4x8xf32> -> vector<4x8xf32>
    %c2_204 = arith.constant 2 : index
    %c2_205 = arith.constant 2 : index
    %c0_206 = arith.constant 0 : index
    %c0_207 = arith.constant 0 : index
    %183 = vector.load %arg3[%c2_204, %c2_205, %c0_206, %c0_207] : memref<3x9x4x4xf32, #tpu.memory_space<vmem>>, vector<1x1x4x4xf32>
    %184 = vector.shape_cast %183 : vector<1x1x4x4xf32> to vector<4x4xf32>
    %cst_208 = arith.constant dense<0.000000e+00> : vector<4x8xf32>
    %185 = tpu.matmul %184, %182, %cst_208 {dimension_numbers = #tpu.dot_dimension_numbers<[1], [0], [0], [1], [0, 0, 1, 1], [], []>} : vector<4x4xf32>, vector<4x8xf32>, vector<4x8xf32> -> vector<4x8xf32>
    %186 = arith.addf %179, %185 : vector<4x8xf32>
    %c3_209 = arith.constant 3 : index
    %c0_210 = arith.constant 0 : index
    %c0_211 = arith.constant 0 : index
    %187 = vector.load %arg6[%c3_209, %c0_210, %c0_211] : memref<9x8x8xf32, #tpu.memory_space<vmem>>, vector<1x8x8xf32>
    %188 = vector.shape_cast %187 : vector<1x8x8xf32> to vector<8x8xf32>
    %cst_212 = arith.constant dense<0.000000e+00> : vector<4x8xf32>
    %189 = tpu.matmul %164, %188, %cst_212 {dimension_numbers = #tpu.dot_dimension_numbers<[1], [0], [0], [1], [0, 0, 1, 1], [], []>} : vector<4x8xf32>, vector<8x8xf32>, vector<4x8xf32> -> vector<4x8xf32>
    %c2_213 = arith.constant 2 : index
    %c3_214 = arith.constant 3 : index
    %c0_215 = arith.constant 0 : index
    %c0_216 = arith.constant 0 : index
    %190 = vector.load %arg3[%c2_213, %c3_214, %c0_215, %c0_216] : memref<3x9x4x4xf32, #tpu.memory_space<vmem>>, vector<1x1x4x4xf32>
    %191 = vector.shape_cast %190 : vector<1x1x4x4xf32> to vector<4x4xf32>
    %cst_217 = arith.constant dense<0.000000e+00> : vector<4x8xf32>
    %192 = tpu.matmul %191, %189, %cst_217 {dimension_numbers = #tpu.dot_dimension_numbers<[1], [0], [0], [1], [0, 0, 1, 1], [], []>} : vector<4x4xf32>, vector<4x8xf32>, vector<4x8xf32> -> vector<4x8xf32>
    %193 = arith.addf %186, %192 : vector<4x8xf32>
    %c4_218 = arith.constant 4 : index
    %c0_219 = arith.constant 0 : index
    %c0_220 = arith.constant 0 : index
    %194 = vector.load %arg6[%c4_218, %c0_219, %c0_220] : memref<9x8x8xf32, #tpu.memory_space<vmem>>, vector<1x8x8xf32>
    %195 = vector.shape_cast %194 : vector<1x8x8xf32> to vector<8x8xf32>
    %cst_221 = arith.constant dense<0.000000e+00> : vector<4x8xf32>
    %196 = tpu.matmul %164, %195, %cst_221 {dimension_numbers = #tpu.dot_dimension_numbers<[1], [0], [0], [1], [0, 0, 1, 1], [], []>} : vector<4x8xf32>, vector<8x8xf32>, vector<4x8xf32> -> vector<4x8xf32>
    %c2_222 = arith.constant 2 : index
    %c4_223 = arith.constant 4 : index
    %c0_224 = arith.constant 0 : index
    %c0_225 = arith.constant 0 : index
    %197 = vector.load %arg3[%c2_222, %c4_223, %c0_224, %c0_225] : memref<3x9x4x4xf32, #tpu.memory_space<vmem>>, vector<1x1x4x4xf32>
    %198 = vector.shape_cast %197 : vector<1x1x4x4xf32> to vector<4x4xf32>
    %cst_226 = arith.constant dense<0.000000e+00> : vector<4x8xf32>
    %199 = tpu.matmul %198, %196, %cst_226 {dimension_numbers = #tpu.dot_dimension_numbers<[1], [0], [0], [1], [0, 0, 1, 1], [], []>} : vector<4x4xf32>, vector<4x8xf32>, vector<4x8xf32> -> vector<4x8xf32>
    %200 = arith.addf %193, %199 : vector<4x8xf32>
    %c5_227 = arith.constant 5 : index
    %c0_228 = arith.constant 0 : index
    %c0_229 = arith.constant 0 : index
    %201 = vector.load %arg6[%c5_227, %c0_228, %c0_229] : memref<9x8x8xf32, #tpu.memory_space<vmem>>, vector<1x8x8xf32>
    %202 = vector.shape_cast %201 : vector<1x8x8xf32> to vector<8x8xf32>
    %cst_230 = arith.constant dense<0.000000e+00> : vector<4x8xf32>
    %203 = tpu.matmul %164, %202, %cst_230 {dimension_numbers = #tpu.dot_dimension_numbers<[1], [0], [0], [1], [0, 0, 1, 1], [], []>} : vector<4x8xf32>, vector<8x8xf32>, vector<4x8xf32> -> vector<4x8xf32>
    %c2_231 = arith.constant 2 : index
    %c5_232 = arith.constant 5 : index
    %c0_233 = arith.constant 0 : index
    %c0_234 = arith.constant 0 : index
    %204 = vector.load %arg3[%c2_231, %c5_232, %c0_233, %c0_234] : memref<3x9x4x4xf32, #tpu.memory_space<vmem>>, vector<1x1x4x4xf32>
    %205 = vector.shape_cast %204 : vector<1x1x4x4xf32> to vector<4x4xf32>
    %cst_235 = arith.constant dense<0.000000e+00> : vector<4x8xf32>
    %206 = tpu.matmul %205, %203, %cst_235 {dimension_numbers = #tpu.dot_dimension_numbers<[1], [0], [0], [1], [0, 0, 1, 1], [], []>} : vector<4x4xf32>, vector<4x8xf32>, vector<4x8xf32> -> vector<4x8xf32>
    %207 = arith.addf %200, %206 : vector<4x8xf32>
    %c6_236 = arith.constant 6 : index
    %c0_237 = arith.constant 0 : index
    %c0_238 = arith.constant 0 : index
    %208 = vector.load %arg6[%c6_236, %c0_237, %c0_238] : memref<9x8x8xf32, #tpu.memory_space<vmem>>, vector<1x8x8xf32>
    %209 = vector.shape_cast %208 : vector<1x8x8xf32> to vector<8x8xf32>
    %cst_239 = arith.constant dense<0.000000e+00> : vector<4x8xf32>
    %210 = tpu.matmul %164, %209, %cst_239 {dimension_numbers = #tpu.dot_dimension_numbers<[1], [0], [0], [1], [0, 0, 1, 1], [], []>} : vector<4x8xf32>, vector<8x8xf32>, vector<4x8xf32> -> vector<4x8xf32>
    %c2_240 = arith.constant 2 : index
    %c6_241 = arith.constant 6 : index
    %c0_242 = arith.constant 0 : index
    %c0_243 = arith.constant 0 : index
    %211 = vector.load %arg3[%c2_240, %c6_241, %c0_242, %c0_243] : memref<3x9x4x4xf32, #tpu.memory_space<vmem>>, vector<1x1x4x4xf32>
    %212 = vector.shape_cast %211 : vector<1x1x4x4xf32> to vector<4x4xf32>
    %cst_244 = arith.constant dense<0.000000e+00> : vector<4x8xf32>
    %213 = tpu.matmul %212, %210, %cst_244 {dimension_numbers = #tpu.dot_dimension_numbers<[1], [0], [0], [1], [0, 0, 1, 1], [], []>} : vector<4x4xf32>, vector<4x8xf32>, vector<4x8xf32> -> vector<4x8xf32>
    %214 = arith.addf %207, %213 : vector<4x8xf32>
    %c7_245 = arith.constant 7 : index
    %c0_246 = arith.constant 0 : index
    %c0_247 = arith.constant 0 : index
    %215 = vector.load %arg6[%c7_245, %c0_246, %c0_247] : memref<9x8x8xf32, #tpu.memory_space<vmem>>, vector<1x8x8xf32>
    %216 = vector.shape_cast %215 : vector<1x8x8xf32> to vector<8x8xf32>
    %cst_248 = arith.constant dense<0.000000e+00> : vector<4x8xf32>
    %217 = tpu.matmul %164, %216, %cst_248 {dimension_numbers = #tpu.dot_dimension_numbers<[1], [0], [0], [1], [0, 0, 1, 1], [], []>} : vector<4x8xf32>, vector<8x8xf32>, vector<4x8xf32> -> vector<4x8xf32>
    %c2_249 = arith.constant 2 : index
    %c7_250 = arith.constant 7 : index
    %c0_251 = arith.constant 0 : index
    %c0_252 = arith.constant 0 : index
    %218 = vector.load %arg3[%c2_249, %c7_250, %c0_251, %c0_252] : memref<3x9x4x4xf32, #tpu.memory_space<vmem>>, vector<1x1x4x4xf32>
    %219 = vector.shape_cast %218 : vector<1x1x4x4xf32> to vector<4x4xf32>
    %cst_253 = arith.constant dense<0.000000e+00> : vector<4x8xf32>
    %220 = tpu.matmul %219, %217, %cst_253 {dimension_numbers = #tpu.dot_dimension_numbers<[1], [0], [0], [1], [0, 0, 1, 1], [], []>} : vector<4x4xf32>, vector<4x8xf32>, vector<4x8xf32> -> vector<4x8xf32>
    %221 = arith.addf %214, %220 : vector<4x8xf32>
    %c8_254 = arith.constant 8 : index
    %c0_255 = arith.constant 0 : index
    %c0_256 = arith.constant 0 : index
    %222 = vector.load %arg6[%c8_254, %c0_255, %c0_256] : memref<9x8x8xf32, #tpu.memory_space<vmem>>, vector<1x8x8xf32>
    %223 = vector.shape_cast %222 : vector<1x8x8xf32> to vector<8x8xf32>
    %cst_257 = arith.constant dense<0.000000e+00> : vector<4x8xf32>
    %224 = tpu.matmul %164, %223, %cst_257 {dimension_numbers = #tpu.dot_dimension_numbers<[1], [0], [0], [1], [0, 0, 1, 1], [], []>} : vector<4x8xf32>, vector<8x8xf32>, vector<4x8xf32> -> vector<4x8xf32>
    %c2_258 = arith.constant 2 : index
    %c8_259 = arith.constant 8 : index
    %c0_260 = arith.constant 0 : index
    %c0_261 = arith.constant 0 : index
    %225 = vector.load %arg3[%c2_258, %c8_259, %c0_260, %c0_261] : memref<3x9x4x4xf32, #tpu.memory_space<vmem>>, vector<1x1x4x4xf32>
    %226 = vector.shape_cast %225 : vector<1x1x4x4xf32> to vector<4x4xf32>
    %cst_262 = arith.constant dense<0.000000e+00> : vector<4x8xf32>
    %227 = tpu.matmul %226, %224, %cst_262 {dimension_numbers = #tpu.dot_dimension_numbers<[1], [0], [0], [1], [0, 0, 1, 1], [], []>} : vector<4x4xf32>, vector<4x8xf32>, vector<4x8xf32> -> vector<4x8xf32>
    %228 = arith.addf %221, %227 : vector<4x8xf32>
    %c3_263 = arith.constant 3 : index
    %c0_264 = arith.constant 0 : index
    %c0_265 = arith.constant 0 : index
    %229 = vector.load %arg7[%c3_263, %c0_264, %c0_265] : memref<4x4x1xf32, #tpu.memory_space<vmem>>, vector<1x4x1xf32>
    %230 = vector.shape_cast %229 : vector<1x4x1xf32> to vector<4x1xf32>
    %231 = vector.broadcast %230 : vector<4x1xf32> to vector<4x8xf32>
    %232 = arith.addf %228, %231 : vector<4x8xf32>
    %cst_266 = arith.constant 0.000000e+00 : f32
    %233 = vector.broadcast %cst_266 : f32 to vector<4x8xf32>
    %234 = arith.cmpf ogt, %232, %233 : vector<4x8xf32>
    %c3_267 = arith.constant 3 : index
    %c0_268 = arith.constant 0 : index
    %c0_269 = arith.constant 0 : index
    %235 = vector.load %arg8[%c3_267, %c0_268, %c0_269] : memref<4x1x1xf32, #tpu.memory_space<vmem>>, vector<1x1x1xf32>
    %236 = vector.shape_cast %235 : vector<1x1x1xf32> to vector<1x1xf32>
    %237 = vector.broadcast %236 : vector<1x1xf32> to vector<4x8xf32>
    %238 = arith.mulf %232, %237 : vector<4x8xf32>
    %239 = arith.select %234, %232, %238 : vector<4x8xi1>, vector<4x8xf32>
    %c0_270 = arith.constant 0 : index
    %c0_271 = arith.constant 0 : index
    %240 = vector.load %arg9[%c0_270, %c0_271] : memref<8x8xf32, #tpu.memory_space<vmem>>, vector<8x8xf32>
    %cst_272 = arith.constant dense<0.000000e+00> : vector<4x8xf32>
    %241 = tpu.matmul %239, %240, %cst_272 {dimension_numbers = #tpu.dot_dimension_numbers<[1], [0], [0], [1], [0, 0, 1, 1], [], []>} : vector<4x8xf32>, vector<8x8xf32>, vector<4x8xf32> -> vector<4x8xf32>
    %c0_273 = arith.constant 0 : index
    %c0_274 = arith.constant 0 : index
    %242 = vector.load %arg10[%c0_273, %c0_274] : memref<4x4xf32, #tpu.memory_space<vmem>>, vector<4x4xf32>
    %cst_275 = arith.constant dense<0.000000e+00> : vector<4x8xf32>
    %243 = tpu.matmul %242, %241, %cst_275 {dimension_numbers = #tpu.dot_dimension_numbers<[1], [0], [0], [1], [0, 0, 1, 1], [], []>} : vector<4x4xf32>, vector<4x8xf32>, vector<4x8xf32> -> vector<4x8xf32>
    %c0_276 = arith.constant 0 : index
    %c0_277 = arith.constant 0 : index
    %244 = vector.load %arg11[%c0_276, %c0_277] : memref<4x1xf32, #tpu.memory_space<vmem>>, vector<4x1xf32>
    %245 = vector.broadcast %244 : vector<4x1xf32> to vector<4x8xf32>
    %246 = arith.addf %243, %245 : vector<4x8xf32>
    %cst_278 = arith.constant 0.000000e+00 : f32
    %247 = vector.broadcast %cst_278 : f32 to vector<4x8xf32>
    %248 = arith.maximumf %246, %247 : vector<4x8xf32>
    %c0_279 = arith.constant 0 : index
    %c0_280 = arith.constant 0 : index
    %249 = vector.load %arg12[%c0_279, %c0_280] : memref<4x4xf32, #tpu.memory_space<vmem>>, vector<4x4xf32>
    %cst_281 = arith.constant dense<0.000000e+00> : vector<4x8xf32>
    %250 = tpu.matmul %249, %248, %cst_281 {dimension_numbers = #tpu.dot_dimension_numbers<[1], [0], [0], [1], [0, 0, 1, 1], [], []>} : vector<4x4xf32>, vector<4x8xf32>, vector<4x8xf32> -> vector<4x8xf32>
    %c0_282 = arith.constant 0 : index
    %c0_283 = arith.constant 0 : index
    %251 = vector.load %arg13[%c0_282, %c0_283] : memref<4x1xf32, #tpu.memory_space<vmem>>, vector<4x1xf32>
    %252 = vector.broadcast %251 : vector<4x1xf32> to vector<4x8xf32>
    %253 = arith.addf %250, %252 : vector<4x8xf32>
    %254 = vector.extract_strided_slice %253 {offsets = [0, 0], sizes = [4, 1], strides = [1, 1]} : vector<4x8xf32> to vector<4x1xf32>
    %255 = arith.negf %254 : vector<4x1xf32>
    %256 = math.exp %255 : vector<4x1xf32>
    %cst_284 = arith.constant 1.000000e+00 : f32
    %257 = vector.broadcast %cst_284 : f32 to vector<4x1xf32>
    %258 = arith.addf %257, %256 : vector<4x1xf32>
    %259 = arith.divf %257, %258 : vector<4x1xf32>
    %c0_285 = arith.constant 0 : index
    %c0_286 = arith.constant 0 : index
    %c0_287 = arith.constant 0 : index
    %260 = vector.load %arg14[%c0_285, %c0_286, %c0_287] : memref<1x4x1xf32, #tpu.memory_space<vmem>>, vector<1x4x1xf32>
    %261 = vector.shape_cast %260 : vector<1x4x1xf32> to vector<4x1xf32>
    %262 = vector.shape_cast %259 : vector<4x1xf32> to vector<1x4x1xf32>
    tpu.vector_store %arg14[%c0_285, %c0_286, %c0_287], %262 {strides = array<i32>} : memref<1x4x1xf32, #tpu.memory_space<vmem>>, vector<1x4x1xf32>,
    return
  }
  func.func @transform_0(%arg0: i32) -> (i32, i32, i32) {
    %c0_i32 = arith.constant 0 : i32
    %c0_i32_0 = arith.constant 0 : i32
    %c0_i32_1 = arith.constant 0 : i32
    return %arg0, %c0_i32, %c0_i32_0 : i32, i32, i32
  }
  func.func @transform_1(%arg0: i32) -> (i32, i32) {
    %c0_i32 = arith.constant 0 : i32
    %c0_i32_0 = arith.constant 0 : i32
    %c0_i32_1 = arith.constant 0 : i32
    return %c0_i32, %c0_i32_0 : i32, i32
  }
  func.func @transform_2(%arg0: i32) -> (i32, i32, i32, i32) {
    %c0_i32 = arith.constant 0 : i32
    %c0_i32_0 = arith.constant 0 : i32
    %c0_i32_1 = arith.constant 0 : i32
    %c0_i32_2 = arith.constant 0 : i32
    %c0_i32_3 = arith.constant 0 : i32
    return %c0_i32, %c0_i32_0, %c0_i32_1, %c0_i32_2 : i32, i32, i32, i32
  }
  func.func @transform_3(%arg0: i32) -> (i32, i32, i32) {
    %c0_i32 = arith.constant 0 : i32
    %c0_i32_0 = arith.constant 0 : i32
    %c0_i32_1 = arith.constant 0 : i32
    %c0_i32_2 = arith.constant 0 : i32
    return %c0_i32, %c0_i32_0, %c0_i32_1 : i32, i32, i32
  }
  func.func @transform_4(%arg0: i32) -> (i32, i32, i32) {
    %c0_i32 = arith.constant 0 : i32
    %c0_i32_0 = arith.constant 0 : i32
    %c0_i32_1 = arith.constant 0 : i32
    %c0_i32_2 = arith.constant 0 : i32
    return %c0_i32, %c0_i32_0, %c0_i32_1 : i32, i32, i32
  }
  func.func @transform_5(%arg0: i32) -> (i32, i32, i32) {
    %c0_i32 = arith.constant 0 : i32
    %c0_i32_0 = arith.constant 0 : i32
    %c0_i32_1 = arith.constant 0 : i32
    %c0_i32_2 = arith.constant 0 : i32
    return %c0_i32, %c0_i32_0, %c0_i32_1 : i32, i32, i32
  }
  func.func @transform_6(%arg0: i32) -> (i32, i32, i32) {
    %c0_i32 = arith.constant 0 : i32
    %c0_i32_0 = arith.constant 0 : i32
    %c0_i32_1 = arith.constant 0 : i32
    %c0_i32_2 = arith.constant 0 : i32
    return %c0_i32, %c0_i32_0, %c0_i32_1 : i32, i32, i32
  }
  func.func @transform_7(%arg0: i32) -> (i32, i32, i32) {
    %c0_i32 = arith.constant 0 : i32
    %c0_i32_0 = arith.constant 0 : i32
    %c0_i32_1 = arith.constant 0 : i32
    %c0_i32_2 = arith.constant 0 : i32
    return %c0_i32, %c0_i32_0, %c0_i32_1 : i32, i32, i32
  }
  func.func @transform_8(%arg0: i32) -> (i32, i32) {
    %c0_i32 = arith.constant 0 : i32
    %c0_i32_0 = arith.constant 0 : i32
    %c0_i32_1 = arith.constant 0 : i32
    return %c0_i32, %c0_i32_0 : i32, i32
  }
  func.func @transform_9(%arg0: i32) -> (i32, i32) {
    %c0_i32 = arith.constant 0 : i32
    %c0_i32_0 = arith.constant 0 : i32
    %c0_i32_1 = arith.constant 0 : i32
    return %c0_i32, %c0_i32_0 : i32, i32
  }
  func.func @transform_10(%arg0: i32) -> (i32, i32) {
    %c0_i32 = arith.constant 0 : i32
    %c0_i32_0 = arith.constant 0 : i32
    %c0_i32_1 = arith.constant 0 : i32
    return %c0_i32, %c0_i32_0 : i32, i32
  }
  func.func @transform_11(%arg0: i32) -> (i32, i32) {
    %c0_i32 = arith.constant 0 : i32
    %c0_i32_0 = arith.constant 0 : i32
    %c0_i32_1 = arith.constant 0 : i32
    return %c0_i32, %c0_i32_0 : i32, i32
  }
  func.func @transform_12(%arg0: i32) -> (i32, i32) {
    %c0_i32 = arith.constant 0 : i32
    %c0_i32_0 = arith.constant 0 : i32
    %c0_i32_1 = arith.constant 0 : i32
    return %c0_i32, %c0_i32_0 : i32, i32
  }
  func.func @transform_13(%arg0: i32) -> (i32, i32, i32) {
    %c0_i32 = arith.constant 0 : i32
    %c0_i32_0 = arith.constant 0 : i32
    %c0_i32_1 = arith.constant 0 : i32
    return %arg0, %c0_i32, %c0_i32_0 : i32, i32, i32
  }
}

</mosaic_0001>

<bundles_post_ra>
// kernel: tpu_custom_call.1
= control target key start
LH: loop header
LB: loop body
LE: loop exit
PB: predicated region body
PF: predicated region fallthrough
CT: control target
= control target key end

     0   :  { %s2593_s25 = smov 0   ;;  %s3280_s0 = inlined_call_operand.vmem [shape: f32[2,4,100], index: 0, kind: input, shape index: {}]   ;;  %s3281_s1 = inlined_call_operand.vmem [shape: f32[4,4], index: 1, kind: input, shape index: {}]   ;;  %s3282_s2 = inlined_call_operand.vmem [shape: f32[3,9,4,4], index: 2, kind: input, shape index: {}]   ;;  %s3283_s3 = inlined_call_operand.vmem [shape: f32[9,100,16], index: 3, kind: input, shape index: {}]   ;;  %s3284_s4 = inlined_call_operand.vmem [shape: f32[9,16,8], index: 4, kind: input, shape index: {}]   ;;  %s3285_s5 = inlined_call_operand.vmem [shape: f32[9,8,8], index: 5, kind: input, shape index: {}]   ;;  %s3286_s6 = inlined_call_operand.vmem [shape: f32[4,4,1], index: 6, kind: input, shape index: {}]   ;;  %s3287_s7 = inlined_call_operand.vmem [shape: f32[4,1,1], index: 7, kind: input, shape index: {}]   ;;  %s3288_s8 = inlined_call_operand.vmem [shape: f32[8,8], index: 8, kind: input, shape index: {}]   ;;  %s3289_s9 = inlined_call_operand.vmem [shape: f32[4,4], index: 9, kind: input, shape index: {}]   ;;  %s3290_s10 = inlined_call_operand.vmem [shape: f32[4,1], index: 10, kind: input, shape index: {}]   ;;  %s3291_s11 = inlined_call_operand.vmem [shape: f32[4,4], index: 11, kind: input, shape index: {}]   ;;  %s3292_s12 = inlined_call_operand.vmem [shape: f32[4,1], index: 12, kind: input, shape index: {}]   ;;  %s3293_s13 = inlined_call_operand.vmem [shape: f32[2,4,1], index: 13, kind: output, shape index: {}]  }
   0x1 LB: > { %s2227_s26 = sadd.s32 4294967295, %s2520_s25   ;;  %p2231_p0 = scmp.ge.s32.totalorder %s2520_s25, 1  ;;  %s2520_s25 = sphi %s2593_s25, %s23_s25  }
   0x2   : > { %p386_p1 = scmp.lt.s32.totalorder %s2520_s25, 3 }
   0x4   : > { %p387_p2 = pnand %p2231_p0, %p386_p1 }
   0x5   : > { %p428_p3 = scmp.lt.s32.totalorder (!%p387_p2), %s2227_s26, 1 }
   0x6   : > { %390 = sbr.rel (%p387_p2) target bundleno = 2181 (0x885), region = 72 }
   0xb   : > { %v438_v0 = vld [vmem:[%s3286_s6] sm:$0xf]  ;;  %v2522_v1 = vmov 0   ;;  %s3295_s26 = smov (!%p428_p3, %s2227_s26), 1  ;;  %vm448_vm0 = vcmask 1043456   ;;  %vm444_vm1 = vcmask 31744  }
   0xc   : > { %2503 = vset.pattern.permute.xlu0 %v2522_v1  ;;  %2504 = vset.pattern.permute.xlu1 %v2522_v1  ;;  %v2250_v2 = vld [vmem:[%s3283_s3 + $0xc8] sm:$0xf]  ;;  %v2249_v3 = vld [vmem:[%s3283_s3 + $0xc0] sm:$0xff]  ;;  %s2232_s16 = sshll.u32 %s3295_s26, 2  ;;  %v2248_v5 = vld [vmem:[%s3283_s3 + $0xb8] sm:$0xff]  ;;  %vm495_vm3 = vcmask 818176  }
   0xd   : > { %441 = vperm.xlu0 %2503, %v438_v0   ;;  %2505 = vset.pattern.permute.xlu2 %v2522_v1  ;;  %s431_s19 = scalar_lea.vmem %s3280_s0, %s2232_s16  ;;  %v437_v4 = vld [vmem:[%s3281_s1] sm:$0xf]  ;;  %v2247_v8 = vld [vmem:[%s3283_s3 + $0xb0] sm:$0xff]  ;;  %v2246_v10 = vld [vmem:[%s3283_s3 + $0xa8] sm:$0xff]  ;;  %vm1097_vm5 = vcmask 130048   ;;  %vm1584_vm7 = vcmask 64512   ;;  %s435_s22 = scalar_lea.vmem %s3293_s13, %s2232_s16 }
   0xe   : > { %2251 = vmatpush.msk.msra.mxu2 %vm448_vm0, %v2250_v2  ;;  %v436_v6 = vld [vmem:[%s431_s19] sm:$0xf]  ;;  %v2244_v12 = vld [vmem:[%s3283_s3 + $0x98] sm:$0xff]  ;;  %v2484_v13 = vld [vmem:[%s3286_s6 + $0xc] sm:$0xf]  ;;  %vm2172_vm12 = vcmask 3072  }
   0xf   : > { %v2506_v7 = vld [vmem:[%s3287_s7] ss:$0 sm:$0xff]  ;;  %2234 = vmatpush.msk.msra.mxu1 %vm448_vm0, %v436_v6  ;;  %v2243_v14 = vld [vmem:[%s3283_s3 + $0x90] sm:$0xff]  ;;  %v2242_v15 = vld [vmem:[%s3283_s3 + $0x88] sm:$0xff] }
  0x10   : > { %544 = vmatpush.msra.mxu2 %v2249_v3  ;;  %v494_v9 = vld [vmem:[%s3283_s3 + $0x60] sm:$0xf]  ;;  %2235 = vmatmul.msk.f32.vlgmr.msra.gmra.mxu1 %vm444_vm1, %v437_v4  ;;  %v2240_v17 = vld [vmem:[%s3283_s3 + $0x78] sm:$0xff]  ;;  %v2239_v19 = vld [vmem:[%s3283_s3 + $0x70] sm:$0xff] }
  0x11   : > { %2236 = vmatpush.msk.msrb.mxu1 %vm448_vm0, %v494_v9  ;;  %v2245_v11 = vld [vmem:[%s3283_s3 + $0xa0] sm:$0xff]  ;;  %v2238_v20 = vld [vmem:[%s3283_s3 + $0x68] sm:$0xff]  ;;  %v2305_v22 = vld [vmem:[%s3283_s3 + $0x1f8] sm:$0xff] }
  0x12   : > { %545 = vmatpush.msra.mxu2 %v2248_v5  ;;  %v2241_v16 = vld [vmem:[%s3283_s3 + $0x80] sm:$0xff]  ;;  %v493_v23 = vld [vmem:[%s3283_s3 + $0x58] sm:$0xff]  ;;  %v492_v24 = vld [vmem:[%s3283_s3 + $0x50] sm:$0xff] }
  0x13   : > { %v2121_v18 = vld [vmem:[%s3292_s12] sm:$0xf]  ;;  %506 = vmatpush.msrb.mxu1 %v493_v23  ;;  %v2304_v25 = vld [vmem:[%s3283_s3 + $0x1f0] sm:$0xff]  ;;  %v491_v26 = vld [vmem:[%s3283_s3 + $0x48] sm:$0xff] }
  0x14   : > { %546 = vmatpush.msra.mxu2 %v2247_v8  ;;  %v2306_v21 = vld [vmem:[%s3283_s3 + $0x200] sm:$0xf]  ;;  %v2303_v27 = vld [vmem:[%s3283_s3 + $0x1e8] sm:$0xff]  ;;  %v2301_v30 = vld [vmem:[%s3283_s3 + $0x1d8] sm:$0xff] }
  0x15   : > { %477 = vperm.xlu0 %2503, %v2506_v7   ;;  %507 = vmatpush.msrb.mxu1 %v492_v24  ;;  %v2302_v28 = vld [vmem:[%s3283_s3 + $0x1e0] sm:$0xff]  ;;  %v489_v31 = vld [vmem:[%s3283_s3 + $0x38] sm:$0xff]  ;;  %v488_v32 = vld [vmem:[%s3283_s3 + $0x30] sm:$0xff] }
  0x16   : > { %547 = vmatpush.msra.mxu2 %v2246_v10  ;;  %v490_v29 = vld [vmem:[%s3283_s3 + $0x40] sm:$0xff]  ;;  %v2300_v33 = vld [vmem:[%s3283_s3 + $0x1d0] sm:$0xff]  ;;  %v487_v34 = vld [vmem:[%s3283_s3 + $0x28] sm:$0xff] }
  0x17   : > { %508 = vmatpush.msrb.mxu1 %v491_v26  ;;  %v2299_v35 = vld [vmem:[%s3283_s3 + $0x1c8] sm:$0xff]  ;;  %v2298_v36 = vld [vmem:[%s3283_s3 + $0x1c0] sm:$0xff]  ;;  %v2297_v38 = vld [vmem:[%s3283_s3 + $0x1b8] sm:$0xff] }
  0x18   : > { %548 = vmatpush.msra.mxu2 %v2245_v11  ;;  %v486_v37 = vld [vmem:[%s3283_s3 + $0x20] sm:$0xff]  ;;  %v485_v39 = vld [vmem:[%s3283_s3 + $0x18] sm:$0xff]  ;;  %v484_v40 = vld [vmem:[%s3283_s3 + $0x10] sm:$0xff] }
  0x19   : > { %509 = vmatpush.msrb.mxu1 %v490_v29  ;;  %v2296_v41 = vld [vmem:[%s3283_s3 + $0x1b0] sm:$0xff]  ;;  %v483_v42 = vld [vmem:[%s3283_s3 + $0x8] sm:$0xff]  ;;  %v482_v44 = vld [vmem:[%s3283_s3] sm:$0xff] }
  0x1a   : > { %549 = vmatpush.msra.mxu2 %v2244_v12  ;;  %v2295_v43 = vld [vmem:[%s3283_s3 + $0x1a8] sm:$0xff]  ;;  %v2294_v45 = vld [vmem:[%s3283_s3 + $0x1a0] sm:$0xff]  ;;  %v2360_v51 = vld [vmem:[%s3283_s3 + $0x338] sm:$0xf] }
  0x1b   : > { %510 = vmatpush.msrb.mxu1 %v489_v31  ;;  %v2359_v53 = vld [vmem:[%s3283_s3 + $0x330] sm:$0xff]  ;;  %v2358_v54 = vld [vmem:[%s3283_s3 + $0x328] sm:$0xff]  ;;  %v2357_v55 = vld [vmem:[%s3283_s3 + $0x320] sm:$0xff] }
  0x1c   : > { %550 = vmatpush.msra.mxu2 %v2243_v14  ;;  %v2356_v56 = vld [vmem:[%s3283_s3 + $0x318] sm:$0xff]  ;;  %v2355_v57 = vld [vmem:[%s3283_s3 + $0x310] sm:$0xff]  ;;  %v2354_v58 = vld [vmem:[%s3283_s3 + $0x308] sm:$0xff] }
  0x1d   : > { %2047 = vperm.xlu0 %2503, %v2484_v13   ;;  %511 = vmatpush.msrb.mxu1 %v488_v32  ;;  %v2353_v59 = vld [vmem:[%s3283_s3 + $0x300] sm:$0xff]  ;;  %v2352_v60 = vld [vmem:[%s3283_s3 + $0x2f8] sm:$0xff]  ;;  %v2351_v61 = vld [vmem:[%s3283_s3 + $0x2f0] sm:$0xff] }
  0x1e   : > { %551 = vmatpush.msra.mxu2 %v2242_v15  ;;  %v2350_v62 = vld [vmem:[%s3283_s3 + $0x2e8] sm:$0xff]  ;;  %v2349_v63 = vld [vmem:[%s3283_s3 + $0x2e0] sm:$0xff]  ;;  %v2348_v0 = vld [vmem:[%s3283_s3 + $0x2d8] sm:$0xff] }
  0x1f   : > { %512 = vmatpush.msrb.mxu1 %v487_v34  ;;  %v522_v1 = vld [vmem:[%s3282_s2] sm:$0xf]  ;;  %v2270_v3 = vld [vmem:[%s3283_s3 + $0x130] sm:$0xf]  ;;  %v2253_v5 = vld [vmem:[%s3282_s2 + $0x4] sm:$0xf] }
  0x20   : > { %552 = vmatpush.msra.mxu2 %v2241_v16  ;;  %v2269_v6 = vld [vmem:[%s3283_s3 + $0x128] sm:$0xff]  ;;  %v2268_v7 = vld [vmem:[%s3283_s3 + $0x120] sm:$0xff]  ;;  %v2267_v8 = vld [vmem:[%s3283_s3 + $0x118] sm:$0xff] }
  0x21   : > { %513 = vmatpush.msrb.mxu1 %v486_v37  ;;  %v2266_v9 = vld [vmem:[%s3283_s3 + $0x110] sm:$0xff]  ;;  %v2265_v10 = vld [vmem:[%s3283_s3 + $0x108] sm:$0xff]  ;;  %v2264_v11 = vld [vmem:[%s3283_s3 + $0x100] sm:$0xff] }
  0x22   : > { %553 = vmatpush.msra.mxu2 %v2240_v17  ;;  %v2263_v12 = vld [vmem:[%s3283_s3 + $0xf8] sm:$0xff]  ;;  %v2262_v13 = vld [vmem:[%s3283_s3 + $0xf0] sm:$0xff]  ;;  %v2261_v14 = vld [vmem:[%s3283_s3 + $0xe8] sm:$0xff] }
  0x23   : > { %514 = vmatpush.msrb.mxu1 %v485_v39  ;;  %v2260_v15 = vld [vmem:[%s3283_s3 + $0xe0] sm:$0xff]  ;;  %v2259_v16 = vld [vmem:[%s3283_s3 + $0xd8] sm:$0xff]  ;;  %v2258_v17 = vld [vmem:[%s3283_s3 + $0xd0] sm:$0xff] }
  0x24   : > { %554 = vmatpush.msra.mxu2 %v2239_v19  ;;  %v2287_v23 = vld [vmem:[%s3283_s3 + $0x190] sm:$0xff]  ;;  %v2286_v24 = vld [vmem:[%s3283_s3 + $0x188] sm:$0xff]  ;;  %v2284_v26 = vld [vmem:[%s3283_s3 + $0x178] sm:$0xff] }
  0x25   : > { %2124 = vperm.xlu0 %2503, %v2121_v18   ;;  %515 = vmatpush.msrb.mxu1 %v484_v40  ;;  %v2281_v29 = vld [vmem:[%s3283_s3 + $0x160] sm:$0xff]  ;;  %v2279_v31 = vld [vmem:[%s3283_s3 + $0x150] sm:$0xff]  ;;  %v2278_v32 = vld [vmem:[%s3283_s3 + $0x148] sm:$0xff] }
  0x26   : > { %555 = vmatpush.msra.mxu2 %v2238_v20  ;;  %v2273_v20 = vld [vmem:[%s3282_s2 + $0x8] sm:$0xf]  ;;  %v2276_v34 = vld [vmem:[%s3283_s3 + $0x138] sm:$0xff]  ;;  %v2340_v37 = vld [vmem:[%s3283_s3 + $0x2c0] sm:$0xff] }
  0x27   : > { %516 = vmatpush.msrb.mxu1 %v483_v42  ;;  %v2338_v39 = vld [vmem:[%s3283_s3 + $0x2b0] sm:$0xff]  ;;  %v2337_v40 = vld [vmem:[%s3283_s3 + $0x2a8] sm:$0xff]  ;;  %v2335_v42 = vld [vmem:[%s3283_s3 + $0x298] sm:$0xff] }
  0x28   : > { %2307 = vmatpush.msk.msrb.mxu2 %vm448_vm0, %v2306_v21 }
  0x29   : > { %517 = vmatpush.msrb.mxu1 %v482_v44  ;;  %v2333_v44 = vld [vmem:[%s3283_s3 + $0x288] sm:$0xff] }
  0x2a   : > { %767 = vmatpush.msrb.mxu2 %v2305_v22  ;;  %v2288_v22 = vld [vmem:[%s3283_s3 + $0x198] sm:$0xf] }
  0x2c   : > { %768 = vmatpush.msrb.mxu2 %v2304_v25  ;;  %v2285_v25 = vld [vmem:[%s3283_s3 + $0x180] sm:$0xff] }
  0x2e   : > { %769 = vmatpush.msrb.mxu2 %v2303_v27  ;;  %v2283_v27 = vld [vmem:[%s3283_s3 + $0x170] sm:$0xff] }
  0x30   : > { %770 = vmatpush.msrb.mxu2 %v2302_v28  ;;  %v2282_v28 = vld [vmem:[%s3283_s3 + $0x168] sm:$0xff] }
  0x32   : > { %771 = vmatpush.msrb.mxu2 %v2301_v30  ;;  %v2280_v30 = vld [vmem:[%s3283_s3 + $0x158] sm:$0xff] }
  0x34   : > { %772 = vmatpush.msrb.mxu2 %v2300_v33  ;;  %v2277_v33 = vld [vmem:[%s3283_s3 + $0x140] sm:$0xff] }
  0x36   : > { %773 = vmatpush.msrb.mxu2 %v2299_v35  ;;  %v2342_v35 = vld [vmem:[%s3283_s3 + $0x2d0] sm:$0xf] }
  0x38   : > { %774 = vmatpush.msrb.mxu2 %v2298_v36  ;;  %v2341_v36 = vld [vmem:[%s3283_s3 + $0x2c8] sm:$0xff] }
  0x3a   : > { %775 = vmatpush.msrb.mxu2 %v2297_v38  ;;  %v2339_v38 = vld [vmem:[%s3283_s3 + $0x2b8] sm:$0xff] }
  0x3c   : > { %776 = vmatpush.msrb.mxu2 %v2296_v41  ;;  %v2336_v41 = vld [vmem:[%s3283_s3 + $0x2a0] sm:$0xff] }
  0x3e   : > { %777 = vmatpush.msrb.mxu2 %v2295_v43  ;;  %v2334_v43 = vld [vmem:[%s3283_s3 + $0x290] sm:$0xff] }
  0x40   : > { %778 = vmatpush.msrb.mxu2 %v2294_v45  ;;  %v2332_v45 = vld [vmem:[%s3283_s3 + $0x280] sm:$0xff] }
  0x7f   : > { %v442_v46 = vpop.permute.xlu0 %441 }
  0x87   : > { %v478_v49 = vpop.permute.xlu0 %477 }
  0x8d   : > { %v469_v47 = vpop.f32.mrf.mxu1 }
  0x8e   : > { %v470_v48 = vadd.f32 %v469_v47, %v442_v46  ;;  %v2331_v46 = vld [vmem:[%s3283_s3 + $0x278] sm:$0xff]  ;;  %v2330_v47 = vld [vmem:[%s3283_s3 + $0x270] sm:$0xff] }
  0x90   : > { %vm472_vm2 = vcmp.gt.f32.partialorder %v470_v48, 0.0  ;;  %v480_v50 = vmul.f32 %v478_v49, %v470_v48 }
  0x92   : > { %v2749_v52 = vsel %vm472_vm2, %v470_v48, %v480_v50  ;;  %v2309_v48 = vld [vmem:[%s3282_s2 + $0x10] sm:$0xf] }
  0x93   : > { %2237 = vmatmul.msk.f32.vlgmr.msrb.gmra.mxu1 %vm495_vm3, %v2749_v52  ;;  %2252 = vmatmul.msk.f32.vlgmr.msra.gmra.mxu2 %vm495_vm3, %v2749_v52 }
  0x94   : > { %2361 = vmatpush.msk.msra.mxu2 %vm448_vm0, %v2360_v51 }
  0x96   : > { %965 = vmatpush.msra.mxu2 %v2359_v53 }
  0x98   : > { %966 = vmatpush.msra.mxu2 %v2358_v54  ;;  %v2291_v54 = vld [vmem:[%s3282_s2 + $0xc] sm:$0xf] }
  0x9a   : > { %967 = vmatpush.msra.mxu2 %v2357_v55 }
  0x9b   : > { %2308 = vmatmul.msk.f32.vlgmr.msrb.gmra.mxu2 %vm495_vm3, %v2749_v52 }
  0x9c   : > { %968 = vmatpush.msra.mxu2 %v2356_v56  ;;  %v2324_v56 = vld [vmem:[%s3283_s3 + $0x268] sm:$0xf] }
  0x9e   : > { %969 = vmatpush.msra.mxu2 %v2355_v57  ;;  %v2323_v57 = vld [vmem:[%s3283_s3 + $0x260] sm:$0xff] }
  0xa0   : > { %970 = vmatpush.msra.mxu2 %v2354_v58  ;;  %v2322_v58 = vld [vmem:[%s3283_s3 + $0x258] sm:$0xff] }
  0xa2   : > { %971 = vmatpush.msra.mxu2 %v2353_v59  ;;  %v2321_v59 = vld [vmem:[%s3283_s3 + $0x250] sm:$0xff] }
  0xa4   : > { %972 = vmatpush.msra.mxu2 %v2352_v60  ;;  %v2320_v60 = vld [vmem:[%s3283_s3 + $0x248] sm:$0xff] }
  0xa6   : > { %973 = vmatpush.msra.mxu2 %v2351_v61  ;;  %v2319_v61 = vld [vmem:[%s3283_s3 + $0x240] sm:$0xff] }
  0xa8   : > { %974 = vmatpush.msra.mxu2 %v2350_v62  ;;  %v2318_v62 = vld [vmem:[%s3283_s3 + $0x238] sm:$0xff] }
  0xaa   : > { %975 = vmatpush.msra.mxu2 %v2349_v63  ;;  %v2317_v63 = vld [vmem:[%s3283_s3 + $0x230] sm:$0xff] }
  0xac   : > { %976 = vmatpush.msra.mxu2 %v2348_v0  ;;  %v2316_v0 = vld [vmem:[%s3283_s3 + $0x228] sm:$0xff] }
  0xad   : > { %2362 = vmatmul.msk.f32.vlgmr.msra.gmra.mxu2 %vm495_vm3, %v2749_v52 }
 0x110   : > { %v519_v2 = vpop.f32.mrf.mxu1 }
 0x111   : > { %2256 = vmatpush.msk.msra.mxu0 %vm448_vm0, %v519_v2  ;;  %v2314_v2 = vld [vmem:[%s3283_s3 + $0x218] sm:$0xff] }
 0x112   : > { %2257 = vmatmul.msk.f32.vlgmr.msra.gmra.mxu0 %vm444_vm1, %v522_v1  ;;  %v2315_v1 = vld [vmem:[%s3283_s3 + $0x220] sm:$0xff] }
 0x116   : > { %v557_v4 = vpop.f32.mrf.mxu2 }
 0x117   : > { %2254 = vmatpush.msk.msra.mxu3 %vm448_vm0, %v557_v4  ;;  %v2312_v4 = vld [vmem:[%s3283_s3 + $0x208] sm:$0xff] }
 0x118   : > { %2255 = vmatmul.msk.f32.vlgmr.msra.gmra.mxu3 %vm444_vm1, %v2253_v5  ;;  %v2378_v5 = vld [vmem:[%s3283_s3 + $0x3a0] sm:$0xf] }
 0x119   : > { %2271 = vmatpush.msk.msrb.mxu3 %vm448_vm0, %v2270_v3  ;;  %v2313_v3 = vld [vmem:[%s3283_s3 + $0x210] sm:$0xff] }
 0x11b   : > { %635 = vmatpush.msrb.mxu3 %v2269_v6  ;;  %v2377_v6 = vld [vmem:[%s3283_s3 + $0x398] sm:$0xff] }
 0x11d   : > { %636 = vmatpush.msrb.mxu3 %v2268_v7  ;;  %v2376_v7 = vld [vmem:[%s3283_s3 + $0x390] sm:$0xff] }
 0x11e   : > { %v780_v18 = vpop.f32.mrf.mxu2 }
 0x11f   : > { %637 = vmatpush.msrb.mxu3 %v2267_v8  ;;  %v2375_v8 = vld [vmem:[%s3283_s3 + $0x388] sm:$0xff] }
 0x121   : > { %638 = vmatpush.msrb.mxu3 %v2266_v9  ;;  %v2374_v9 = vld [vmem:[%s3283_s3 + $0x380] sm:$0xff] }
 0x123   : > { %639 = vmatpush.msrb.mxu3 %v2265_v10  ;;  %v2373_v10 = vld [vmem:[%s3283_s3 + $0x378] sm:$0xff] }
 0x125   : > { %640 = vmatpush.msrb.mxu3 %v2264_v11  ;;  %v2372_v11 = vld [vmem:[%s3283_s3 + $0x370] sm:$0xff] }
 0x127   : > { %641 = vmatpush.msrb.mxu3 %v2263_v12  ;;  %v2371_v12 = vld [vmem:[%s3283_s3 + $0x368] sm:$0xff] }
 0x129   : > { %642 = vmatpush.msrb.mxu3 %v2262_v13  ;;  %v2370_v13 = vld [vmem:[%s3283_s3 + $0x360] sm:$0xff] }
 0x12b   : > { %643 = vmatpush.msrb.mxu3 %v2261_v14  ;;  %v2369_v14 = vld [vmem:[%s3283_s3 + $0x358] sm:$0xff] }
 0x12d   : > { %644 = vmatpush.msrb.mxu3 %v2260_v15  ;;  %v2368_v15 = vld [vmem:[%s3283_s3 + $0x350] sm:$0xff] }
 0x12f   : > { %645 = vmatpush.msrb.mxu3 %v2259_v16  ;;  %v2367_v16 = vld [vmem:[%s3283_s3 + $0x348] sm:$0xff] }
 0x131   : > { %646 = vmatpush.msrb.mxu3 %v2258_v17  ;;  %v2366_v17 = vld [vmem:[%s3283_s3 + $0x340] sm:$0xff] }
 0x132   : > { %2272 = vmatmul.msk.f32.vlgmr.msrb.gmra.mxu3 %vm495_vm3, %v2749_v52 }
 0x133   : > { %2310 = vmatpush.msk.msra.mxu3 %vm448_vm0, %v780_v18 }
 0x13a   : > { %2311 = vmatmul.msk.f32.vlgmr.msra.gmra.mxu3 %vm444_vm1, %v2309_v48 }
 0x18f   : > { %v611_v49 = vpop.f32.mrf.mxu0 }
 0x19b   : > { %v585_v19 = vpop.f32.mrf.mxu3 }
 0x19c   : > { %v612_v50 = vadd.f32 %v611_v49, %v585_v19 }
 0x1b5   : > { %v648_v21 = vpop.f32.mrf.mxu3 }
 0x1b6   : > { %2274 = vmatpush.msk.msrb.mxu0 %vm448_vm0, %v648_v21  ;;  %v2507_v21 = vld [vmem:[%s3287_s7 + $0x1] ss:$0 sm:$0xff] }
 0x1b7   : > { %2275 = vmatmul.msk.f32.vlgmr.msrb.gmra.mxu0 %vm444_vm1, %v2273_v20  ;;  %v2384_v20 = vld [vmem:[%s3286_s6 + $0x4] sm:$0xf] }
 0x1b8   : > { %2289 = vmatpush.msk.msra.mxu0 %vm448_vm0, %v2288_v22  ;;  %1080 = vperm.xlu1 %2504, %v2384_v20   ;;  %v2327_v22 = vld [vmem:[%s3282_s2 + $0x14] sm:$0xf]  ;;  %v2429_v20 = vld [vmem:[%s3282_s2 + $0x40] sm:$0xf] }
 0x1ba   : > { %701 = vmatpush.msra.mxu0 %v2287_v23 }
 0x1bc   : > { %702 = vmatpush.msra.mxu0 %v2286_v24  ;;  %v2508_v24 = vld [vmem:[%s3287_s7 + $0x3] ss:$0 sm:$0xff] }
 0x1be   : > { %703 = vmatpush.msra.mxu0 %v2285_v25  ;;  %v978_v25 = vpop.f32.mrf.mxu2 }
 0x1c0   : > { %704 = vmatpush.msra.mxu0 %v2284_v26  ;;  %1090 = vperm.xlu1 %2504, %v2507_v21   ;;  %v2345_v26 = vld [vmem:[%s3282_s2 + $0x18] sm:$0xf] }
 0x1c2   : > { %705 = vmatpush.msra.mxu0 %v2283_v27  ;;  %v2363_v27 = vld [vmem:[%s3282_s2 + $0x1c] sm:$0xf] }
 0x1c4   : > { %706 = vmatpush.msra.mxu0 %v2282_v28  ;;  %v2381_v28 = vld [vmem:[%s3282_s2 + $0x20] sm:$0xf] }
 0x1c6   : > { %707 = vmatpush.msra.mxu0 %v2281_v29 }
 0x1c8   : > { %708 = vmatpush.msra.mxu0 %v2280_v30  ;;  %2057 = vperm.xlu1 %2504, %v2508_v24   ;;  %v808_v30 = vpop.f32.mrf.mxu3  ;;  %v2442_v24 = vld [vmem:[%s3285_s5 + $0x8] sm:$0xff] }
 0x1ca   : > { %709 = vmatpush.msra.mxu0 %v2279_v31  ;;  %v1096_v31 = vld [vmem:[%s3284_s4 + $0x8] sm:$0xff] }
 0x1cc   : > { %710 = vmatpush.msra.mxu0 %v2278_v32  ;;  %v2389_v32 = vld [vmem:[%s3284_s4 + $0x18] sm:$0xff] }
 0x1ce   : > { %711 = vmatpush.msra.mxu0 %v2277_v33  ;;  %v2397_v33 = vld [vmem:[%s3284_s4 + $0x28] sm:$0xff] }
 0x1cf   : > { %1217 = vmatpush.msrb.mxu2 %v2397_v33 }
 0x1d0   : > { %712 = vmatpush.msra.mxu0 %v2276_v34 }
 0x1d1   : > { %2290 = vmatmul.msk.f32.vlgmr.msra.gmra.mxu0 %vm495_vm3, %v2749_v52 }
 0x1d2   : > { %2343 = vmatpush.msk.msrb.mxu0 %vm448_vm0, %v2342_v35  ;;  %v1095_v35 = vld [vmem:[%s3284_s4] sm:$0xff] }
 0x1d4   : > { %899 = vmatpush.msrb.mxu0 %v2341_v36  ;;  %v2388_v36 = vld [vmem:[%s3284_s4 + $0x10] sm:$0xff] }
 0x1d6   : > { %900 = vmatpush.msrb.mxu0 %v2340_v37  ;;  %v2396_v37 = vld [vmem:[%s3284_s4 + $0x20] sm:$0xff] }
 0x1d7   : > { %1218 = vmatpush.msrb.mxu2 %v2396_v37 }
 0x1d8   : > { %901 = vmatpush.msrb.mxu0 %v2339_v38  ;;  %v2409_v38 = vld [vmem:[%s3284_s4 + $0x48] sm:$0xff] }
 0x1d9   : > { %1321 = vmatpush.msra.mxu2 %v2409_v38 }
 0x1da   : > { %902 = vmatpush.msrb.mxu0 %v2338_v39  ;;  %v2408_v39 = vld [vmem:[%s3284_s4 + $0x40] sm:$0xff] }
 0x1db   : > { %1322 = vmatpush.msra.mxu2 %v2408_v39 }
 0x1dc   : > { %903 = vmatpush.msrb.mxu0 %v2337_v40 }
 0x1de   : > { %904 = vmatpush.msrb.mxu0 %v2336_v41 }
 0x1e0   : > { %905 = vmatpush.msrb.mxu0 %v2335_v42 }
 0x1e2   : > { %906 = vmatpush.msrb.mxu0 %v2334_v43 }
 0x1e4   : > { %907 = vmatpush.msrb.mxu0 %v2333_v44 }
 0x1e6   : > { %908 = vmatpush.msrb.mxu0 %v2332_v45 }
 0x1e8   : > { %909 = vmatpush.msrb.mxu0 %v2331_v46 }
 0x1ea   : > { %910 = vmatpush.msrb.mxu0 %v2330_v47 }
 0x1eb   : > { %2344 = vmatmul.msk.f32.vlgmr.msrb.gmra.mxu0 %vm495_vm3, %v2749_v52 }
 0x1ec   : > { %1140 = vmatpush.msra.mxu0 %v2389_v32 }
 0x1ee   : > { %1141 = vmatpush.msra.mxu0 %v2388_v36 }
 0x22a   : > { %v1081_v43 = vpop.permute.xlu1 %1080 }
 0x234   : > { %v676_v51 = vpop.f32.mrf.mxu0 }
 0x235   : > { %v679_v53 = vadd.f32 %v676_v51, %v612_v50  ;;  %v1091_v50 = vpop.permute.xlu1 %1090 }
 0x24e   : > { %v714_v55 = vpop.f32.mrf.mxu0 }
 0x24f   : > { %2292 = vmatpush.msk.msra.mxu1 %vm448_vm0, %v714_v55  ;;  %v2420_v55 = vld [vmem:[%s3284_s4 + $0x60] sm:$0xff] }
 0x250   : > { %2293 = vmatmul.msk.f32.vlgmr.msra.gmra.mxu1 %vm444_vm1, %v2291_v54  ;;  %v2421_v54 = vld [vmem:[%s3284_s4 + $0x68] sm:$0xff] }
 0x251   : > { %2325 = vmatpush.msk.msrb.mxu1 %vm448_vm0, %v2324_v56  ;;  %v2433_v56 = vld [vmem:[%s3284_s4 + $0x88] sm:$0xff] }
 0x253   : > { %833 = vmatpush.msrb.mxu1 %v2323_v57  ;;  %v2432_v57 = vld [vmem:[%s3284_s4 + $0x80] sm:$0xff] }
 0x255   : > { %834 = vmatpush.msrb.mxu1 %v2322_v58  ;;  %v2391_v58 = vld [vmem:[%s3282_s2 + $0x28] sm:$0xf] }
 0x257   : > { %835 = vmatpush.msrb.mxu1 %v2321_v59 }
 0x259   : > { %836 = vmatpush.msrb.mxu1 %v2320_v60  ;;  %v2387_v60 = vld [vmem:[%s3282_s2 + $0x24] sm:$0xf] }
 0x25b   : > { %837 = vmatpush.msrb.mxu1 %v2319_v61 }
 0x25d   : > { %838 = vmatpush.msrb.mxu1 %v2318_v62  ;;  %v2403_v62 = vld [vmem:[%s3284_s4 + $0x38] sm:$0xff] }
 0x25f   : > { %839 = vmatpush.msrb.mxu1 %v2317_v63 }
 0x261   : > { %840 = vmatpush.msrb.mxu1 %v2316_v0  ;;  %v2399_v0 = vld [vmem:[%s3282_s2 + $0x2c] sm:$0xf] }
 0x263   : > { %841 = vmatpush.msrb.mxu1 %v2315_v1  ;;  %v2402_v1 = vld [vmem:[%s3284_s4 + $0x30] sm:$0xff] }
 0x265   : > { %842 = vmatpush.msrb.mxu1 %v2314_v2  ;;  %v2415_v2 = vld [vmem:[%s3284_s4 + $0x58] sm:$0xff] }
 0x267   : > { %843 = vmatpush.msrb.mxu1 %v2313_v3  ;;  %v2414_v3 = vld [vmem:[%s3284_s4 + $0x50] sm:$0xff] }
 0x269   : > { %844 = vmatpush.msrb.mxu1 %v2312_v4  ;;  %v2427_v4 = vld [vmem:[%s3284_s4 + $0x78] sm:$0xff] }
 0x26a   : > { %2326 = vmatmul.msk.f32.vlgmr.msrb.gmra.mxu1 %vm495_vm3, %v2749_v52 }
 0x26b   : > { %2379 = vmatpush.msk.msra.mxu1 %vm448_vm0, %v2378_v5 }
 0x26d   : > { %1031 = vmatpush.msra.mxu1 %v2377_v6  ;;  %v2411_v6 = vld [vmem:[%s3282_s2 + $0x34] sm:$0xf] }
 0x26f   : > { %1032 = vmatpush.msra.mxu1 %v2376_v7  ;;  %v2426_v7 = vld [vmem:[%s3284_s4 + $0x70] sm:$0xff] }
 0x271   : > { %1033 = vmatpush.msra.mxu1 %v2375_v8 }
 0x273   : > { %1034 = vmatpush.msra.mxu1 %v2374_v9 }
 0x275   : > { %1035 = vmatpush.msra.mxu1 %v2373_v10  ;;  %v2423_v10 = vld [vmem:[%s3282_s2 + $0x3c] sm:$0xf] }
 0x277   : > { %1036 = vmatpush.msra.mxu1 %v2372_v11  ;;  %v2435_v11 = vld [vmem:[%s3282_s2 + $0x44] sm:$0xf] }
 0x279   : > { %1037 = vmatpush.msra.mxu1 %v2371_v12  ;;  %v2438_v12 = vld [vmem:[%s3286_s6 + $0x8] sm:$0xf] }
 0x27a   : > { %1568 = vperm.xlu2 %2505, %v2438_v12  }
 0x27b   : > { %1038 = vmatpush.msra.mxu1 %v2370_v13  ;;  %v2509_v13 = vld [vmem:[%s3287_s7 + $0x2] ss:$0 sm:$0xff] }
 0x27d   : > { %1039 = vmatpush.msra.mxu1 %v2369_v14 }
 0x27f   : > { %1040 = vmatpush.msra.mxu1 %v2368_v15  ;;  %v2405_v15 = vld [vmem:[%s3282_s2 + $0x30] sm:$0xf] }
 0x281   : > { %1041 = vmatpush.msra.mxu1 %v2367_v16 }
 0x282   : > { %1578 = vperm.xlu2 %2505, %v2509_v13  }
 0x283   : > { %1042 = vmatpush.msra.mxu1 %v2366_v17  ;;  %v2087_v17 = vld [vmem:[%s3290_s10] sm:$0xf] }
 0x284   : > { %2380 = vmatmul.msk.f32.vlgmr.msra.gmra.mxu1 %vm495_vm3, %v2749_v52  ;;  %v912_v52 = vpop.f32.mrf.mxu0 }
 0x28a   : > { %2090 = vperm.xlu2 %2505, %v2087_v17  }
 0x2cd   : > { %v742_v18 = vpop.f32.mrf.mxu1 }
 0x2ce   : > { %v745_v19 = vadd.f32 %v742_v18, %v679_v53  ;;  %v2417_v18 = vld [vmem:[%s3282_s2 + $0x38] sm:$0xf] }
 0x2d0   : > { %v811_v42 = vadd.f32 %v808_v30, %v745_v19 }
 0x2e7   : > { %v846_v23 = vpop.f32.mrf.mxu1 }
 0x2e8   : > { %2328 = vmatpush.msk.msrb.mxu3 %vm448_vm0, %v846_v23 }
 0x2e9   : > { %2329 = vmatmul.msk.f32.vlgmr.msrb.gmra.mxu3 %vm444_vm1, %v2327_v22 }
 0x2ea   : > { %2346 = vmatpush.msk.msra.mxu3 %vm448_vm0, %v912_v52  ;;  %v1583_v52 = vld [vmem:[%s3285_s5] sm:$0xff] }
 0x2ec   : > { %2364 = vmatpush.msk.msrb.mxu3 %vm448_vm0, %v978_v25  ;;  %v2449_v25 = vld [vmem:[%s3285_s5 + $0x10] sm:$0xff] }
 0x2f1   : > { %2347 = vmatmul.msk.f32.vlgmr.msra.gmra.mxu3 %vm444_vm1, %v2345_v26 }
 0x2f9   : > { %2365 = vmatmul.msk.f32.vlgmr.msrb.gmra.mxu3 %vm444_vm1, %v2363_v27 }
 0x301   : > { %v1044_v29 = vpop.f32.mrf.mxu1 }
 0x302   : > { %2382 = vmatpush.msk.msra.mxu3 %vm448_vm0, %v1044_v29 }
 0x303   : > { %2383 = vmatmul.msk.f32.vlgmr.msra.gmra.mxu3 %vm444_vm1, %v2381_v28 }
 0x304   : > { %1115 = vmatpush.msrb.mxu3 %v1096_v31 }
 0x306   : > { %1116 = vmatpush.msrb.mxu3 %v1095_v35  ;;  %v1569_v35 = vpop.permute.xlu2 %1568 }
 0x36c   : > { %v874_v34 = vpop.f32.mrf.mxu3 }
 0x36d   : > { %v877_v44 = vadd.f32 %v874_v34, %v811_v42  ;;  %v1579_v42 = vpop.permute.xlu2 %1578 }
 0x374   : > { %v940_v40 = vpop.f32.mrf.mxu3 }
 0x375   : > { %v943_v45 = vadd.f32 %v940_v40, %v877_v44  ;;  %v2459_v44 = vld [vmem:[%s3285_s5 + $0x20] sm:$0xff] }
 0x37c   : > { %v1006_v41 = vpop.f32.mrf.mxu3 }
 0x37d   : > { %v1009_v46 = vadd.f32 %v1006_v41, %v943_v45 }
 0x386   : > { %v1072_v47 = vpop.f32.mrf.mxu3 }
 0x387   : > { %v1075_v48 = vadd.f32 %v1072_v47, %v1009_v46  ;;  %v2469_v46 = vld [vmem:[%s3285_s5 + $0x30] sm:$0xff]  ;;  %v2479_v47 = vld [vmem:[%s3285_s5 + $0x40] sm:$0xff] }
 0x389   : > { %v1083_v49 = vadd.f32 %v1081_v43, %v1075_v48  ;;  %v2444_v48 = vld [vmem:[%s3282_s2 + $0x4c] sm:$0xf] }
 0x38b   : > { %vm1084_vm4 = vcmp.gt.f32.partialorder %v1083_v49, 0.0  ;;  %v1093_v51 = vmul.f32 %v1091_v50, %v1083_v49 }
 0x38d   : > { %v1094_v53 = vsel %vm1084_vm4, %v1083_v49, %v1093_v51  ;;  %v2441_v49 = vld [vmem:[%s3282_s2 + $0x48] sm:$0xf] }
 0x38e   : > { %2386 = vmatmul.msk.f32.vlgmr.msrb.gmra.mxu3 %vm1097_vm5, %v1094_v53  ;;  %2390 = vmatmul.msk.f32.vlgmr.msra.gmra.mxu0 %vm1097_vm5, %v1094_v53 }
 0x38f   : > { %2398 = vmatmul.msk.f32.vlgmr.msrb.gmra.mxu2 %vm1097_vm5, %v1094_v53 }
 0x390   : > { %1425 = vmatpush.msrb.mxu2 %v2421_v54  ;;  %v2464_v54 = vld [vmem:[%s3285_s5 + $0x28] sm:$0xff] }
 0x392   : > { %1426 = vmatpush.msrb.mxu2 %v2420_v55  ;;  %v2451_v55 = vld [vmem:[%s3282_s2 + $0x50] sm:$0xf] }
 0x397   : > { %2410 = vmatmul.msk.f32.vlgmr.msra.gmra.mxu2 %vm1097_vm5, %v1094_v53 }
 0x398   : > { %1529 = vmatpush.msra.mxu2 %v2433_v56 }
 0x39a   : > { %1530 = vmatpush.msra.mxu2 %v2432_v57  ;;  %v2474_v57 = vld [vmem:[%s3285_s5 + $0x38] sm:$0xff] }
 0x39f   : > { %2422 = vmatmul.msk.f32.vlgmr.msrb.gmra.mxu2 %vm1097_vm5, %v1094_v53 }
 0x3a7   : > { %2434 = vmatmul.msk.f32.vlgmr.msra.gmra.mxu2 %vm1097_vm5, %v1094_v53 }
 0x40b   : > { %v1143_v59 = vpop.f32.mrf.mxu0 }
 0x40c   : > { %2392 = vmatpush.msk.msra.mxu3 %vm448_vm0, %v1143_v59 }
 0x40d   : > { %2393 = vmatmul.msk.f32.vlgmr.msra.gmra.mxu3 %vm444_vm1, %v2391_v58  ;;  %v2461_v58 = vld [vmem:[%s3282_s2 + $0x58] sm:$0xf] }
 0x411   : > { %v1118_v61 = vpop.f32.mrf.mxu3 }
 0x412   : > { %v1220_v63 = vpop.f32.mrf.mxu2  ;;  %2394 = vmatpush.msk.msrb.mxu0 %vm448_vm0, %v1118_v61 }
 0x413   : > { %2400 = vmatpush.msk.msrb.mxu3 %vm448_vm0, %v1220_v63  ;;  %2395 = vmatmul.msk.f32.vlgmr.msrb.gmra.mxu0 %vm444_vm1, %v2387_v60  ;;  %v2481_v63 = vld [vmem:[%s3282_s2 + $0x68] sm:$0xf] }
 0x414   : > { %1269 = vmatpush.msra.mxu0 %v2403_v62  ;;  %v2471_v62 = vld [vmem:[%s3282_s2 + $0x60] sm:$0xf] }
 0x415   : > { %2401 = vmatmul.msk.f32.vlgmr.msrb.gmra.mxu3 %vm444_vm1, %v2399_v0 }
 0x416   : > { %1270 = vmatpush.msra.mxu0 %v2402_v1  ;;  %v2456_v1 = vld [vmem:[%s3282_s2 + $0x54] sm:$0xf] }
 0x418   : > { %1373 = vmatpush.msrb.mxu0 %v2415_v2 }
 0x41a   : > { %1374 = vmatpush.msrb.mxu0 %v2414_v3  ;;  %v1324_v5 = vpop.f32.mrf.mxu2  ;;  %v2466_v3 = vld [vmem:[%s3282_s2 + $0x5c] sm:$0xf] }
 0x41b   : > { %2412 = vmatpush.msk.msra.mxu3 %vm448_vm0, %v1324_v5  ;;  %2404 = vmatmul.msk.f32.vlgmr.msra.gmra.mxu0 %vm1097_vm5, %v1094_v53  ;;  %v2476_v5 = vld [vmem:[%s3282_s2 + $0x64] sm:$0xf] }
 0x41c   : > { %1477 = vmatpush.msra.mxu0 %v2427_v4 }
 0x41d   : > { %2413 = vmatmul.msk.f32.vlgmr.msra.gmra.mxu3 %vm444_vm1, %v2411_v6 }
 0x41e   : > { %1478 = vmatpush.msra.mxu0 %v2426_v7 }
 0x422   : > { %v1428_v8 = vpop.f32.mrf.mxu2 }
 0x423   : > { %2424 = vmatpush.msk.msrb.mxu3 %vm448_vm0, %v1428_v8  ;;  %2416 = vmatmul.msk.f32.vlgmr.msrb.gmra.mxu0 %vm1097_vm5, %v1094_v53  ;;  %v2062_v8 = vld [vmem:[%s3288_s8] sm:$0xff] }
 0x424   : > { %1603 = vmatpush.msrb.mxu0 %v1583_v52  ;;  %v2048_v52 = vpop.permute.xlu0 %2047 }
 0x425   : > { %2425 = vmatmul.msk.f32.vlgmr.msrb.gmra.mxu3 %vm444_vm1, %v2423_v10 }
 0x42a   : > { %v1532_v9 = vpop.f32.mrf.mxu2 }
 0x42b   : > { %2436 = vmatpush.msk.msra.mxu3 %vm448_vm0, %v1532_v9  ;;  %2428 = vmatmul.msk.f32.vlgmr.msra.gmra.mxu0 %vm1097_vm5, %v1094_v53  ;;  %v2454_v53 = vld [vmem:[%s3285_s5 + $0x18] sm:$0xff] }
 0x42c   : > { %1703 = vmatpush.msra.mxu0 %v2449_v25  ;;  %v2058_v25 = vpop.permute.xlu1 %2057 }
 0x42d   : > { %2437 = vmatmul.msk.f32.vlgmr.msra.gmra.mxu3 %vm444_vm1, %v2435_v11 }
 0x490   : > { %v1197_v14 = vpop.f32.mrf.mxu0  ;;  %v1171_v22 = vpop.f32.mrf.mxu3 }
 0x491   : > { %v1198_v28 = vadd.f32 %v1197_v14, %v1171_v22 }
 0x498   : > { %v1272_v16 = vpop.f32.mrf.mxu0  ;;  %v1248_v23 = vpop.f32.mrf.mxu3 }
 0x499   : > { %2406 = vmatpush.msk.msrb.mxu1 %vm448_vm0, %v1272_v16  ;;  %v1251_v29 = vadd.f32 %v1248_v23, %v1198_v28  ;;  %v2086_v28 = vld [vmem:[%s3289_s9] sm:$0xf] }
 0x49a   : > { %2407 = vmatmul.msk.f32.vlgmr.msrb.gmra.mxu1 %vm444_vm1, %v2405_v15 }
 0x4a0   : > { %v1376_v19 = vpop.f32.mrf.mxu0  ;;  %v1352_v26 = vpop.f32.mrf.mxu3 }
 0x4a1   : > { %2418 = vmatpush.msk.msra.mxu1 %vm448_vm0, %v1376_v19 }
 0x4a2   : > { %2419 = vmatmul.msk.f32.vlgmr.msra.gmra.mxu1 %vm444_vm1, %v2417_v18 }
 0x4a8   : > { %v1480_v21 = vpop.f32.mrf.mxu0  ;;  %v1456_v31 = vpop.f32.mrf.mxu3 }
 0x4a9   : > { %2430 = vmatpush.msk.msrb.mxu1 %vm448_vm0, %v1480_v21 }
 0x4aa   : > { %2431 = vmatmul.msk.f32.vlgmr.msrb.gmra.mxu1 %vm444_vm1, %v2429_v20 }
 0x4ab   : > { %1627 = vmatpush.msra.mxu1 %v2442_v24 }
 0x4b0   : > { %v1560_v38 = vpop.f32.mrf.mxu3 }
 0x517   : > { %v1300_v27 = vpop.f32.mrf.mxu1 }
 0x518   : > { %v1303_v30 = vadd.f32 %v1300_v27, %v1251_v29 }
 0x51a   : > { %v1355_v33 = vadd.f32 %v1352_v26, %v1303_v30  ;;  %v2091_v30 = vpop.permute.xlu2 %2090 }
 0x51f   : > { %v1404_v32 = vpop.f32.mrf.mxu1 }
 0x520   : > { %v1407_v34 = vadd.f32 %v1404_v32, %v1355_v33 }
 0x522   : > { %v1459_v36 = vadd.f32 %v1456_v31, %v1407_v34  ;;  %v2120_v34 = vld [vmem:[%s3291_s11] sm:$0xf] }
 0x527   : > { %v1508_v37 = vpop.f32.mrf.mxu1 }
 0x528   : > { %v1511_v39 = vadd.f32 %v1508_v37, %v1459_v36 }
 0x52a   : > { %v1563_v40 = vadd.f32 %v1560_v38, %v1511_v39 }
 0x52c   : > { %v1571_v41 = vadd.f32 %v1569_v35, %v1563_v40  ;;  %v2125_v35 = vpop.permute.xlu0 %2124 }
 0x52e   : > { %vm1572_vm6 = vcmp.gt.f32.partialorder %v1571_v41, 0.0  ;;  %v1581_v43 = vmul.f32 %v1579_v42, %v1571_v41 }
 0x530   : > { %v1582_v45 = vsel %vm1572_vm6, %v1571_v41, %v1581_v43 }
 0x531   : > { %2440 = vmatmul.msk.f32.vlgmr.msrb.gmra.mxu0 %vm1584_vm7, %v1582_v45  ;;  %2443 = vmatmul.msk.f32.vlgmr.msra.gmra.mxu1 %vm1584_vm7, %v1582_v45 }
 0x532   : > { %1805 = vmatpush.msrb.mxu0 %v2459_v44 }
 0x539   : > { %2450 = vmatmul.msk.f32.vlgmr.msra.gmra.mxu0 %vm1584_vm7, %v1582_v45 }
 0x53a   : > { %1907 = vmatpush.msra.mxu0 %v2469_v46 }
 0x541   : > { %2460 = vmatmul.msk.f32.vlgmr.msrb.gmra.mxu0 %vm1584_vm7, %v1582_v45 }
 0x542   : > { %2009 = vmatpush.msrb.mxu0 %v2479_v47 }
 0x549   : > { %2470 = vmatmul.msk.f32.vlgmr.msra.gmra.mxu0 %vm1584_vm7, %v1582_v45 }
 0x551   : > { %2480 = vmatmul.msk.f32.vlgmr.msrb.gmra.mxu0 %vm1584_vm7, %v1582_v45 }
 0x5ae   : > { %v1605_v50 = vpop.f32.mrf.mxu0  ;;  %v1629_v51 = vpop.f32.mrf.mxu1 }
 0x5af   : > { %2445 = vmatpush.msk.msrb.mxu2 %vm448_vm0, %v1629_v51  ;;  %2447 = vmatpush.msk.msrb.mxu3 %vm448_vm0, %v1605_v50 }
 0x5b0   : > { %2446 = vmatmul.msk.f32.vlgmr.msrb.gmra.mxu2 %vm444_vm1, %v2444_v48  ;;  %2448 = vmatmul.msk.f32.vlgmr.msrb.gmra.mxu3 %vm444_vm1, %v2441_v49 }
 0x5b1   : > { %1754 = vmatpush.msra.mxu2 %v2454_v53 }
 0x5b3   : > { %1856 = vmatpush.msrb.mxu2 %v2464_v54 }
 0x5b6   : > { %v1705_v56 = vpop.f32.mrf.mxu0 }
 0x5b7   : > { %2452 = vmatpush.msk.msrb.mxu1 %vm448_vm0, %v1705_v56 }
 0x5b8   : > { %2453 = vmatmul.msk.f32.vlgmr.msrb.gmra.mxu1 %vm444_vm1, %v2451_v55  ;;  %2455 = vmatmul.msk.f32.vlgmr.msra.gmra.mxu2 %vm1584_vm7, %v1582_v45 }
 0x5b9   : > { %1958 = vmatpush.msra.mxu2 %v2474_v57 }
 0x5be   : > { %v1807_v59 = vpop.f32.mrf.mxu0 }
 0x5bf   : > { %2462 = vmatpush.msk.msra.mxu1 %vm448_vm0, %v1807_v59 }
 0x5c0   : > { %2465 = vmatmul.msk.f32.vlgmr.msrb.gmra.mxu2 %vm1584_vm7, %v1582_v45  ;;  %2463 = vmatmul.msk.f32.vlgmr.msra.gmra.mxu1 %vm444_vm1, %v2461_v58 }
 0x5c1   : > { %2081 = vmatpush.msrb.mxu2 %v2062_v8 }
 0x5c6   : > { %v1909_v60 = vpop.f32.mrf.mxu0 }
 0x5c7   : > { %2472 = vmatpush.msk.msrb.mxu1 %vm448_vm0, %v1909_v60 }
 0x5c8   : > { %2475 = vmatmul.msk.f32.vlgmr.msra.gmra.mxu2 %vm1584_vm7, %v1582_v45  ;;  %2473 = vmatmul.msk.f32.vlgmr.msrb.gmra.mxu1 %vm444_vm1, %v2471_v62 }
 0x5ce   : > { %v2011_v61 = vpop.f32.mrf.mxu0 }
 0x5cf   : > { %2482 = vmatpush.msk.msra.mxu1 %vm448_vm0, %v2011_v61 }
 0x5d0   : > { %2483 = vmatmul.msk.f32.vlgmr.msra.gmra.mxu1 %vm444_vm1, %v2481_v63 }
 0x633   : > { %v1657_v0 = vpop.f32.mrf.mxu2  ;;  %v1683_v9 = vpop.f32.mrf.mxu3 }
 0x634   : > { %v1684_v11 = vadd.f32 %v1683_v9, %v1657_v0 }
 0x635   : > { %v1733_v7 = vpop.f32.mrf.mxu1 }
 0x636   : > { %v1736_v13 = vadd.f32 %v1733_v7, %v1684_v11 }
 0x63b   : > { %v1756_v2 = vpop.f32.mrf.mxu2 }
 0x63c   : > { %2457 = vmatpush.msk.msra.mxu3 %vm448_vm0, %v1756_v2 }
 0x63d   : > { %2458 = vmatmul.msk.f32.vlgmr.msra.gmra.mxu3 %vm444_vm1, %v2456_v1  ;;  %v1835_v10 = vpop.f32.mrf.mxu1 }
 0x643   : > { %v1858_v4 = vpop.f32.mrf.mxu2 }
 0x644   : > { %2467 = vmatpush.msk.msrb.mxu3 %vm448_vm0, %v1858_v4 }
 0x645   : > { %2468 = vmatmul.msk.f32.vlgmr.msrb.gmra.mxu3 %vm444_vm1, %v2466_v3  ;;  %v1937_v15 = vpop.f32.mrf.mxu1 }
 0x64b   : > { %v1960_v6 = vpop.f32.mrf.mxu2 }
 0x64c   : > { %2477 = vmatpush.msk.msra.mxu3 %vm448_vm0, %v1960_v6 }
 0x64d   : > { %2478 = vmatmul.msk.f32.vlgmr.msra.gmra.mxu3 %vm444_vm1, %v2476_v5  ;;  %v2039_v21 = vpop.f32.mrf.mxu1 }
 0x6c0   : > { %v1784_v12 = vpop.f32.mrf.mxu3 }
 0x6c1   : > { %v1787_v14 = vadd.f32 %v1784_v12, %v1736_v13 }
 0x6c3   : > { %v1838_v17 = vadd.f32 %v1835_v10, %v1787_v14 }
 0x6c8   : > { %v1886_v16 = vpop.f32.mrf.mxu3 }
 0x6c9   : > { %v1889_v18 = vadd.f32 %v1886_v16, %v1838_v17 }
 0x6cb   : > { %v1940_v19 = vadd.f32 %v1937_v15, %v1889_v18 }
 0x6d0   : > { %v1988_v20 = vpop.f32.mrf.mxu3 }
 0x6d1   : > { %v1991_v22 = vadd.f32 %v1988_v20, %v1940_v19 }
 0x6d3   : > { %v2042_v23 = vadd.f32 %v2039_v21, %v1991_v22 }
 0x6d5   : > { %v2050_v24 = vadd.f32 %v2048_v52, %v2042_v23 }
 0x6d7   : > { %vm2051_vm8 = vcmp.gt.f32.partialorder %v2050_v24, 0.0  ;;  %v2060_v26 = vmul.f32 %v2058_v25, %v2050_v24 }
 0x6d9   : > { %v2061_v27 = vsel %vm2051_vm8, %v2050_v24, %v2060_v26 }
 0x6da   : > { %2486 = vmatmul.msk.f32.vlgmr.msrb.gmra.mxu2 %vm1584_vm7, %v2061_v27 }
 0x75d   : > { %v2083_v29 = vpop.f32.mrf.mxu2 }
 0x75e   : > { %2487 = vmatpush.msk.msrb.mxu3 %vm448_vm0, %v2083_v29 }
 0x75f   : > { %2488 = vmatmul.msk.f32.vlgmr.msrb.gmra.mxu3 %vm444_vm1, %v2086_v28 }
 0x7e2   : > { %v2116_v31 = vpop.f32.mrf.mxu3 }
 0x7e3   : > { %v2117_v32 = vadd.f32 %v2116_v31, %v2091_v30 }
 0x7e5   : > { %v2119_v33 = vmax.f32 %v2117_v32, 0.0 }
 0x7e7   : > { %2489 = vmatpush.msk.msra.mxu0 %vm448_vm0, %v2119_v33 }
 0x7e8   : > { %2490 = vmatmul.msk.f32.vlgmr.msra.gmra.mxu0 %vm444_vm1, %v2120_v34 }
 0x865   : > { %v2150_v36 = vpop.f32.mrf.mxu0 }
 0x866   : > { %v2151_v37 = vadd.f32 %v2150_v36, %v2125_v35 }
 0x868   : > { %v2491_v38 = vmul.f32 -1.442695, %v2151_v37 }
 0x86a   : > { %2510 = vpow2.f32 %v2491_v38 }
 0x870   : > { %v2511_v39 = vpop.eup %2510 }
 0x871   : > { %v2156_v40 = vadd.f32 1.0, %v2511_v39 }
 0x873   : > { %2512 = vrcp.f32 %v2156_v40  ;;  %v2168_v44 = vand.u32 2147483648, %v2156_v40  ;;  %v2166_v46 = vand.u32 2147483647, %v2156_v40  ;;  %vm2162_vm10 = vweird.f32 %v2156_v40 }
 0x875   : > { %v2169_v48 = vor.u32 1.1754944e-38, %v2168_v44  ;;  %vm2167_vm13 = vcmp.eq.f32.partialorder %v2166_v46, 8.507059e+37 }
 0x879   : > { %v2513_v41 = vpop.eup %2512 }
 0x87a   : > { %v2158_v42 = vmul.f32 %v2513_v41, %v2156_v40  ;;  %vm2163_vm9 = vweird.f32 %v2513_v41 }
 0x87b   : > { %vm2164_vm11 = vmor %vm2162_vm10, %vm2163_vm9 }
 0x87c   : > { %v2159_v43 = vsub.f32 1.0, %v2158_v42 }
 0x87e   : > { %v2160_v45 = vmul.f32 %v2513_v41, %v2159_v43 }
 0x880   : > { %v2161_v47 = vadd.f32 %v2513_v41, %v2160_v45 }
 0x882   : > { %v2165_v49 = vsel %vm2164_vm11, %v2513_v41, %v2161_v47 }
 0x883   : > { %v2170_v50 = vsel %vm2167_vm13, %v2169_v48, %v2165_v49 }
 0x884   : > { %2173 = vst.msk [vmem:[%s435_s22] sm:$0xf] %vm2172_vm12, %v2170_v50 }
 0x885 PF: > { %s23_s25 = sadd.s32 1, %s2520_s25  }
 0x886   : > { %p20_p4 = scmp.ge.s32.totalorder %s23_s25, 4  }
 0x888   :  { %22 = sbr.rel (!%p20_p4) target bundleno = 1 (0x1), region = 158 }

</bundles_post_ra>
